<compile_context>
chip_gen: v5e
topology: v5e:2x2
jax: 0.10.0
libtpu: 0.0.40
codegen_flags: <defaults>
</compile_context>

<pallas_src>
import jax
import jax.numpy as jnp
from jax.experimental import pallas as pl
from jax.experimental.pallas import tpu as pltpu

# ----------------------- small ViT config (synthetic) -----------------------
IMG = 32          # image size  (vit_base uses 224)
PATCH = 16        # patch size  (same as vit_base_patch16)
IN_CHANS = 3
EMBED_DIM = 64    # vit_base uses 768
DEPTH = 2         # vit_base uses 12
NUM_HEADS = 4     # vit_base uses 12
HEAD_DIM = EMBED_DIM // NUM_HEADS
MLP_HIDDEN = 4 * EMBED_DIM
NUM_CLASSES = 10  # "output_size" of Net
LN_EPS = 1e-6
BATCH = 2

NUM_PATCHES = (IMG // PATCH) ** 2
SEQ = NUM_PATCHES + 1          # +1 cls token
SEQ_PAD = 8                    # per-image token rows padded to a sublane multiple
HEAD_PAD = 128                 # head output padded to a full lane group


# ------------------------------ fused kernel --------------------------------
def _vit_layer_kernel(patches_ref, patch_w_ref, tmpl_ref,
                      ln1_g_ref, ln1_b_ref, qkv_w_ref, qkv_b_ref,
                      proj_w_ref, proj_b_ref, ln2_g_ref, ln2_b_ref,
                      fc1_w_ref, fc1_b_ref, fc2_w_ref, fc2_b_ref,
                      norm_g_ref, norm_b_ref, head_w_ref, head_b_ref,
                      out_ref, xs_ref):
    f32 = jnp.float32
    bf16 = jnp.bfloat16
    l = pl.program_id(1)           # layer index (inner, "arbitrary" axis)

    T = xs_ref.shape[0]            # SEQ_PAD token rows (one image)
    D = xs_ref.shape[1]            # embed dim
    hd = D // NUM_HEADS

    def mm(x, w_bf16):
        # bf16 MXU operands (weights pre-cast in the wrapper), f32 accumulation.
        return jnp.dot(x.astype(bf16), w_bf16, preferred_element_type=f32)

    def ln(x, g, b):
        mu = jnp.mean(x, axis=-1, keepdims=True)
        var = jnp.mean((x - mu) ** 2, axis=-1, keepdims=True)
        return (x - mu) * jax.lax.rsqrt(var + LN_EPS) * g + b

    # Mask out padded key columns (rows SEQ..SEQ_PAD-1 are padding).
    key_is_real = jax.lax.broadcasted_iota(jnp.int32, (T, T), 1) < SEQ

    # ---- layer 0: patch embedding + (cls token, pos embed, patch bias) ----
    # patches_ref is zero on cls/padding rows, so the matmul contributes only on
    # real patch rows; the template already holds cls+pos / patch_bias+pos.
    @pl.when(l == 0)
    def _():
        xs_ref[...] = mm(patches_ref[...], patch_w_ref[...]) + tmpl_ref[...]

    xs = xs_ref[...]                                              # [T, D] f32

    # -------- attention sub-block (pre-norm) --------
    h = ln(xs, ln1_g_ref[0], ln1_b_ref[0])
    qkv = mm(h, qkv_w_ref[0]) + qkv_b_ref[0]                      # [T, 3D]
    q = qkv[:, 0:D]                                               # scale baked into W_q
    kT = qkv[:, D:2 * D].T.astype(bf16)                           # [D, T], one transpose/layer
    v = qkv[:, 2 * D:3 * D].astype(bf16)

    head_outs = []
    for hh in range(NUM_HEADS):
        c0 = hh * hd
        s = jnp.dot(q[:, c0:c0 + hd].astype(bf16), kT[c0:c0 + hd, :],
                    preferred_element_type=f32)                   # [T, T]
        s = jnp.where(key_is_real, s, -1e30)
        p = jnp.exp(s - jnp.max(s, axis=-1, keepdims=True))
        p = p * pl.reciprocal(jnp.sum(p, axis=-1, keepdims=True), approx=True)
        head_outs.append(jnp.dot(p.astype(bf16), v[:, c0:c0 + hd],
                                 preferred_element_type=f32))     # [T, hd]
    ao = jnp.concatenate(head_outs, axis=-1)                      # [T, D]

    xs = xs + mm(ao, proj_w_ref[0]) + proj_b_ref[0]

    # -------- MLP sub-block (pre-norm) --------
    h = ln(xs, ln2_g_ref[0], ln2_b_ref[0])
    h = mm(h, fc1_w_ref[0]) + fc1_b_ref[0]
    h = jax.nn.gelu(h, approximate=True)   # TODO(synk): timm nn.GELU is exact erf
    xs = xs + mm(h, fc2_w_ref[0]) + fc2_b_ref[0]

    xs_ref[...] = xs

    # -------- final LN + classifier head (lane-dense padded output) --------
    @pl.when(l == DEPTH - 1)
    def _():
        hN = ln(xs_ref[...], norm_g_ref[...], norm_b_ref[...])
        out_ref[...] = (mm(hN, head_w_ref[...]) + head_b_ref[...]).astype(out_ref.dtype)


# ------------------------------ parameter init ------------------------------
def init_params(key):
    keys = iter(jax.random.split(key, 8 + DEPTH * 16))

    def nrm(shape, std=0.02):
        return jax.random.normal(next(keys), shape, jnp.float32) * std

    params = {
        # Conv2d(3, D, kernel=P, stride=P) flattened to a matmul. PyTorch weight
        # [D, C, P, P] flattens per-patch in (c, i, j) order -> stored [C*P*P, D].
        "patch_w": nrm((IN_CHANS * PATCH * PATCH, EMBED_DIM)),
        "patch_b": jnp.zeros((EMBED_DIM,), jnp.float32),
        "cls_token": nrm((1, 1, EMBED_DIM)),
        "pos_embed": nrm((1, SEQ, EMBED_DIM)),
        "norm_g": jnp.ones((EMBED_DIM,), jnp.float32),
        "norm_b": jnp.zeros((EMBED_DIM,), jnp.float32),
        "head_w": nrm((EMBED_DIM, NUM_CLASSES)),
        "head_b": jnp.zeros((NUM_CLASSES,), jnp.float32),
        "blocks": [],
    }
    for _ in range(DEPTH):
        params["blocks"].append({
            "ln1_g": jnp.ones((EMBED_DIM,), jnp.float32),
            "ln1_b": jnp.zeros((EMBED_DIM,), jnp.float32),
            "qkv_w": nrm((EMBED_DIM, 3 * EMBED_DIM)),
            "qkv_b": jnp.zeros((3 * EMBED_DIM,), jnp.float32),
            "proj_w": nrm((EMBED_DIM, EMBED_DIM)),
            "proj_b": jnp.zeros((EMBED_DIM,), jnp.float32),
            "ln2_g": jnp.ones((EMBED_DIM,), jnp.float32),
            "ln2_b": jnp.zeros((EMBED_DIM,), jnp.float32),
            "fc1_w": nrm((EMBED_DIM, MLP_HIDDEN)),
            "fc1_b": jnp.zeros((MLP_HIDDEN,), jnp.float32),
            "fc2_w": nrm((MLP_HIDDEN, EMBED_DIM)),
            "fc2_b": jnp.zeros((EMBED_DIM,), jnp.float32),
        })
    return params


# --------------------------------- forward ----------------------------------
def vit_forward(x, params):
    # x: NCHW [B, C, H, W]
    B, C, H, W = x.shape
    nH, nW = H // PATCH, W // PATCH
    nP = nH * nW
    D = EMBED_DIM
    PDIM = C * PATCH * PATCH
    M = B * SEQ_PAD
    scale = HEAD_DIM ** -0.5
    bf16 = jnp.bfloat16

    # Patch extraction in (c, i, j) order == Conv2d weight flattening order.
    patches = (x.reshape(B, C, nH, PATCH, nW, PATCH)
                 .transpose(0, 2, 4, 1, 3, 5)
                 .reshape(B, nP, PDIM))
    # Token-row layout per image: row 0 = cls slot, rows 1..nP = patches,
    # rows SEQ..SEQ_PAD-1 = padding.  Zero rows contribute nothing to the matmul.
    patches_pad = jnp.concatenate([
        jnp.zeros((B, 1, PDIM), jnp.float32),
        patches,
        jnp.zeros((B, SEQ_PAD - SEQ, PDIM), jnp.float32),
    ], axis=1).reshape(M, PDIM)

    # Template added after the patch-embed matmul: folds the patch bias, the cls
    # token and the positional embedding; zero on the padding rows.
    pos = params["pos_embed"][0]                      # [SEQ, D]
    cls = params["cls_token"].reshape(D)
    tmpl_one = jnp.concatenate([
        (cls + pos[0])[None, :],
        params["patch_b"][None, :] + pos[1:SEQ],
        jnp.zeros((SEQ_PAD - SEQ, D), jnp.float32),
    ], axis=0)                                        # [SEQ_PAD, D]
    tmpl = jnp.tile(tmpl_one, (B, 1))                 # [M, D]

    blocks = params["blocks"]
    stack = lambda name: jnp.stack([blk[name] for blk in blocks], axis=0)

    # Bake the 1/sqrt(head_dim) attention scale into the q columns of W_qkv/b_qkv.
    qkv_w = stack("qkv_w")
    qkv_b = stack("qkv_b")
    qkv_w = qkv_w.at[:, :, :D].multiply(scale)
    qkv_b = qkv_b.at[:, :D].multiply(scale)

    # Weight matrices pre-cast to bf16 (halved DMA bytes / VMEM); biases & LN f32.
    patch_w = params["patch_w"].astype(bf16)          # [PDIM, D]
    qkv_w = qkv_w.astype(bf16)                        # [DEPTH, D, 3D]
    qkv_b = qkv_b.reshape(DEPTH, 1, 3 * D)
    proj_w = stack("proj_w").astype(bf16)             # [DEPTH, D, D]
    proj_b = stack("proj_b").reshape(DEPTH, 1, D)
    ln1_g = stack("ln1_g").reshape(DEPTH, 1, D)
    ln1_b = stack("ln1_b").reshape(DEPTH, 1, D)
    ln2_g = stack("ln2_g").reshape(DEPTH, 1, D)
    ln2_b = stack("ln2_b").reshape(DEPTH, 1, D)
    fc1_w = stack("fc1_w").astype(bf16)               # [DEPTH, D, 4D]
    fc1_b = stack("fc1_b").reshape(DEPTH, 1, MLP_HIDDEN)
    fc2_w = stack("fc2_w").astype(bf16)               # [DEPTH, 4D, D]
    fc2_b = stack("fc2_b").reshape(DEPTH, 1, D)
    norm_g = params["norm_g"].reshape(1, D)
    norm_b = params["norm_b"].reshape(1, D)
    # Pad the head to 128 output lanes for a lane-dense store.
    head_w = jnp.zeros((D, HEAD_PAD), jnp.float32).at[:, :NUM_CLASSES].set(
        params["head_w"]).astype(bf16)
    head_b = jnp.zeros((1, HEAD_PAD), jnp.float32).at[0, :NUM_CLASSES].set(
        params["head_b"])

    # ---- BlockSpecs: (image tile, layer) grid; weights streamed per layer ----
    def tok_spec(cols):
        return pl.BlockSpec((SEQ_PAD, cols), lambda b, l: (b, 0))

    def layer_spec(slab):
        return pl.BlockSpec((1,) + slab, lambda b, l: (l, 0, 0))

    def const_spec(shape):
        return pl.BlockSpec(shape, lambda b, l, shape=shape: (0,) * len(shape))

    in_specs = [
        tok_spec(PDIM),                  # patches_pad
        const_spec((PDIM, D)),           # patch_w
        tok_spec(D),                     # tmpl
        layer_spec((1, D)),              # ln1_g
        layer_spec((1, D)),              # ln1_b
        layer_spec((D, 3 * D)),          # qkv_w
        layer_spec((1, 3 * D)),          # qkv_b
        layer_spec((D, D)),              # proj_w
        layer_spec((1, D)),              # proj_b
        layer_spec((1, D)),              # ln2_g
        layer_spec((1, D)),              # ln2_b
        layer_spec((D, MLP_HIDDEN)),     # fc1_w
        layer_spec((1, MLP_HIDDEN)),     # fc1_b
        layer_spec((MLP_HIDDEN, D)),     # fc2_w
        layer_spec((1, D)),              # fc2_b
        const_spec((1, D)),              # norm_g
        const_spec((1, D)),              # norm_b
        const_spec((D, HEAD_PAD)),       # head_w
        const_spec((1, HEAD_PAD)),       # head_b
    ]

    out = pl.pallas_call(
        _vit_layer_kernel,
        out_shape=jax.ShapeDtypeStruct((M, HEAD_PAD), jnp.float32),
        grid=(B, DEPTH),
        in_specs=in_specs,
        out_specs=pl.BlockSpec((SEQ_PAD, HEAD_PAD), lambda b, l: (b, 0)),
        scratch_shapes=[pltpu.VMEM((SEQ_PAD, EMBED_DIM), jnp.float32)],
        compiler_params=pltpu.CompilerParams(
            dimension_semantics=("parallel", "arbitrary")),
    )(patches_pad, patch_w, tmpl,
      ln1_g, ln1_b, qkv_w, qkv_b, proj_w, proj_b,
      ln2_g, ln2_b, fc1_w, fc1_b, fc2_w, fc2_b,
      norm_g, norm_b, head_w, head_b)

    # cls-token row of each image, first NUM_CLASSES lanes.
    logits = out.reshape(B, SEQ_PAD, HEAD_PAD)[:, 0, :NUM_CLASSES]
    return logits                                     # [B, NUM_CLASSES]


# ----------------------------------- main ------------------------------------
if __name__ == "__main__":
    key = jax.random.PRNGKey(0)
    kx, kp = jax.random.split(key)
    x = jax.random.normal(kx, (BATCH, IN_CHANS, IMG, IMG), jnp.float32)
    params = init_params(kp)

    fwd = jax.jit(vit_forward)
    out = jax.block_until_ready(fwd(x, params))
    assert out.shape == (BATCH, NUM_CLASSES), out.shape
    assert bool(jnp.all(jnp.isfinite(out)))
    print("KERNEL_OK")
</pallas_src>

<mosaic_0001>
module attributes {stable_mosaic.version = 11 : i64} {
  func.func @_vit_layer_kernel(%arg0: i32, %arg1: i32, %arg2: memref<8x768xf32, #tpu.memory_space<vmem>>, %arg3: memref<768x64xbf16, #tpu.memory_space<vmem>>, %arg4: memref<8x64xf32, #tpu.memory_space<vmem>>, %arg5: memref<1x1x64xf32, #tpu.memory_space<vmem>>, %arg6: memref<1x1x64xf32, #tpu.memory_space<vmem>>, %arg7: memref<1x64x192xbf16, #tpu.memory_space<vmem>>, %arg8: memref<1x1x192xf32, #tpu.memory_space<vmem>>, %arg9: memref<1x64x64xbf16, #tpu.memory_space<vmem>>, %arg10: memref<1x1x64xf32, #tpu.memory_space<vmem>>, %arg11: memref<1x1x64xf32, #tpu.memory_space<vmem>>, %arg12: memref<1x1x64xf32, #tpu.memory_space<vmem>>, %arg13: memref<1x64x256xbf16, #tpu.memory_space<vmem>>, %arg14: memref<1x1x256xf32, #tpu.memory_space<vmem>>, %arg15: memref<1x256x64xbf16, #tpu.memory_space<vmem>>, %arg16: memref<1x1x64xf32, #tpu.memory_space<vmem>>, %arg17: memref<1x64xf32, #tpu.memory_space<vmem>>, %arg18: memref<1x64xf32, #tpu.memory_space<vmem>>, %arg19: memref<64x128xbf16, #tpu.memory_space<vmem>>, %arg20: memref<1x128xf32, #tpu.memory_space<vmem>>, %arg21: memref<8x128xf32, #tpu.memory_space<vmem>>, %arg22: memref<8x64xf32, #tpu.memory_space<vmem>>) attributes {dimension_semantics = [#tpu.dimension_semantics<parallel>, #tpu.dimension_semantics<arbitrary>], iteration_bounds = array<i64: 2, 2>, scalar_prefetch = 0 : i64, scratch_operands = 1 : i64, tpu.core_type = #tpu.core_type<tc>, window_params = [{transform_indices = @transform_0, window_bounds = array<i64: 8, 768>}, {pipeline_mode = #tpu.pipeline_mode<synchronous>, transform_indices = @transform_1, window_bounds = array<i64: 768, 64>}, {transform_indices = @transform_2, window_bounds = array<i64: 8, 64>}, {transform_indices = @transform_3, window_bounds = array<i64: 1, 1, 64>}, {transform_indices = @transform_4, window_bounds = array<i64: 1, 1, 64>}, {transform_indices = @transform_5, window_bounds = array<i64: 1, 64, 192>}, {transform_indices = @transform_6, window_bounds = array<i64: 1, 1, 192>}, {transform_indices = @transform_7, window_bounds = array<i64: 1, 64, 64>}, {transform_indices = @transform_8, window_bounds = array<i64: 1, 1, 64>}, {transform_indices = @transform_9, window_bounds = array<i64: 1, 1, 64>}, {transform_indices = @transform_10, window_bounds = array<i64: 1, 1, 64>}, {transform_indices = @transform_11, window_bounds = array<i64: 1, 64, 256>}, {transform_indices = @transform_12, window_bounds = array<i64: 1, 1, 256>}, {transform_indices = @transform_13, window_bounds = array<i64: 1, 256, 64>}, {transform_indices = @transform_14, window_bounds = array<i64: 1, 1, 64>}, {pipeline_mode = #tpu.pipeline_mode<synchronous>, transform_indices = @transform_15, window_bounds = array<i64: 1, 64>}, {pipeline_mode = #tpu.pipeline_mode<synchronous>, transform_indices = @transform_16, window_bounds = array<i64: 1, 64>}, {pipeline_mode = #tpu.pipeline_mode<synchronous>, transform_indices = @transform_17, window_bounds = array<i64: 64, 128>}, {pipeline_mode = #tpu.pipeline_mode<synchronous>, transform_indices = @transform_18, window_bounds = array<i64: 1, 128>}, {transform_indices = @transform_19, window_bounds = array<i64: 8, 128>}]} {
    %0 = tpu.iota {dimensions = array<i32: 1>} : vector<8x8xi32>
    %c5_i32 = arith.constant 5 : i32
    %1 = vector.broadcast %c5_i32 : i32 to vector<8x8xi32>
    %2 = arith.cmpi slt, %0, %1 : vector<8x8xi32>
    %c0_i32 = arith.constant 0 : i32
    %3 = arith.cmpi eq, %arg1, %c0_i32 : i32
    %4 = arith.extui %3 : i1 to i32
    %c0_i32_0 = arith.constant 0 : i32
    %5 = arith.cmpi ne, %4, %c0_i32_0 : i32
    scf.if %5 {
      %c0_78 = arith.constant 0 : index
      %c0_79 = arith.constant 0 : index
      %193 = vector.load %arg2[%c0_78, %c0_79] : memref<8x768xf32, #tpu.memory_space<vmem>>, vector<8x768xf32>
      %c0_80 = arith.constant 0 : index
      %c0_81 = arith.constant 0 : index
      %194 = vector.load %arg3[%c0_80, %c0_81] : memref<768x64xbf16, #tpu.memory_space<vmem>>, vector<768x64xbf16>
      %195 = arith.truncf %193 : vector<8x768xf32> to vector<8x768xbf16>
      %cst_82 = arith.constant dense<0.000000e+00> : vector<8x64xf32>
      %196 = tpu.matmul %195, %194, %cst_82 {dimension_numbers = #tpu.dot_dimension_numbers<[1], [0], [0], [1], [0, 0, 1, 1], [], []>} : vector<8x768xbf16>, vector<768x64xbf16>, vector<8x64xf32> -> vector<8x64xf32>
      %c0_83 = arith.constant 0 : index
      %c0_84 = arith.constant 0 : index
      %197 = vector.load %arg4[%c0_83, %c0_84] : memref<8x64xf32, #tpu.memory_space<vmem>>, vector<8x64xf32>
      %198 = arith.addf %196, %197 : vector<8x64xf32>
      %c0_85 = arith.constant 0 : index
      %c0_86 = arith.constant 0 : index
      %199 = vector.load %arg22[%c0_85, %c0_86] : memref<8x64xf32, #tpu.memory_space<vmem>>, vector<8x64xf32>
      tpu.vector_store %arg22[%c0_85, %c0_86], %198 {strides = array<i32>} : memref<8x64xf32, #tpu.memory_space<vmem>>, vector<8x64xf32>,
    } else {
    }
    %c0 = arith.constant 0 : index
    %c0_1 = arith.constant 0 : index
    %6 = vector.load %arg22[%c0, %c0_1] : memref<8x64xf32, #tpu.memory_space<vmem>>, vector<8x64xf32>
    %c0_2 = arith.constant 0 : index
    %c0_3 = arith.constant 0 : index
    %c0_4 = arith.constant 0 : index
    %7 = vector.load %arg5[%c0_2, %c0_3, %c0_4] : memref<1x1x64xf32, #tpu.memory_space<vmem>>, vector<1x1x64xf32>
    %8 = vector.shape_cast %7 : vector<1x1x64xf32> to vector<1x64xf32>
    %c0_5 = arith.constant 0 : index
    %c0_6 = arith.constant 0 : index
    %c0_7 = arith.constant 0 : index
    %9 = vector.load %arg6[%c0_5, %c0_6, %c0_7] : memref<1x1x64xf32, #tpu.memory_space<vmem>>, vector<1x1x64xf32>
    %10 = vector.shape_cast %9 : vector<1x1x64xf32> to vector<1x64xf32>
    %cst = arith.constant dense<0.000000e+00> : vector<8xf32>
    %11 = vector.multi_reduction <add>, %6, %cst [1] : vector<8x64xf32> to vector<8xf32>
    %12 = vector.shape_cast %11 : vector<8xf32> to vector<8x1xf32>
    %cst_8 = arith.constant 6.400000e+01 : f32
    %13 = vector.broadcast %cst_8 : f32 to vector<8x1xf32>
    %14 = arith.divf %12, %13 : vector<8x1xf32>
    %15 = vector.broadcast %14 : vector<8x1xf32> to vector<8x64xf32>
    %16 = arith.subf %6, %15 : vector<8x64xf32>
    %17 = arith.mulf %16, %16 : vector<8x64xf32>
    %cst_9 = arith.constant dense<0.000000e+00> : vector<8xf32>
    %18 = vector.multi_reduction <add>, %17, %cst_9 [1] : vector<8x64xf32> to vector<8xf32>
    %19 = vector.shape_cast %18 : vector<8xf32> to vector<8x1xf32>
    %cst_10 = arith.constant 6.400000e+01 : f32
    %20 = vector.broadcast %cst_10 : f32 to vector<8x1xf32>
    %21 = arith.divf %19, %20 : vector<8x1xf32>
    %22 = vector.broadcast %14 : vector<8x1xf32> to vector<8x64xf32>
    %23 = arith.subf %6, %22 : vector<8x64xf32>
    %cst_11 = arith.constant 9.99999997E-7 : f32
    %24 = vector.broadcast %cst_11 : f32 to vector<8x1xf32>
    %25 = arith.addf %21, %24 : vector<8x1xf32>
    %26 = math.rsqrt %25 : vector<8x1xf32>
    %27 = vector.broadcast %26 : vector<8x1xf32> to vector<8x64xf32>
    %28 = arith.mulf %23, %27 : vector<8x64xf32>
    %29 = vector.broadcast %8 : vector<1x64xf32> to vector<8x64xf32>
    %30 = arith.mulf %28, %29 : vector<8x64xf32>
    %31 = vector.broadcast %10 : vector<1x64xf32> to vector<8x64xf32>
    %32 = arith.addf %30, %31 : vector<8x64xf32>
    %c0_12 = arith.constant 0 : index
    %c0_13 = arith.constant 0 : index
    %c0_14 = arith.constant 0 : index
    %33 = vector.load %arg7[%c0_12, %c0_13, %c0_14] : memref<1x64x192xbf16, #tpu.memory_space<vmem>>, vector<1x64x192xbf16>
    %34 = vector.shape_cast %33 : vector<1x64x192xbf16> to vector<64x192xbf16>
    %35 = arith.truncf %32 : vector<8x64xf32> to vector<8x64xbf16>
    %cst_15 = arith.constant dense<0.000000e+00> : vector<8x192xf32>
    %36 = tpu.matmul %35, %34, %cst_15 {dimension_numbers = #tpu.dot_dimension_numbers<[1], [0], [0], [1], [0, 0, 1, 1], [], []>} : vector<8x64xbf16>, vector<64x192xbf16>, vector<8x192xf32> -> vector<8x192xf32>
    %c0_16 = arith.constant 0 : index
    %c0_17 = arith.constant 0 : index
    %c0_18 = arith.constant 0 : index
    %37 = vector.load %arg8[%c0_16, %c0_17, %c0_18] : memref<1x1x192xf32, #tpu.memory_space<vmem>>, vector<1x1x192xf32>
    %38 = vector.shape_cast %37 : vector<1x1x192xf32> to vector<1x192xf32>
    %39 = vector.broadcast %38 : vector<1x192xf32> to vector<8x192xf32>
    %40 = arith.addf %36, %39 : vector<8x192xf32>
    %41 = vector.extract_strided_slice %40 {offsets = [0, 0], sizes = [8, 64], strides = [1, 1]} : vector<8x192xf32> to vector<8x64xf32>
    %42 = vector.extract_strided_slice %40 {offsets = [0, 64], sizes = [8, 64], strides = [1, 1]} : vector<8x192xf32> to vector<8x64xf32>
    %43 = tpu.transpose %42, [1, 0] : vector<8x64xf32> -> vector<64x8xf32>
    %44 = arith.truncf %43 : vector<64x8xf32> to vector<64x8xbf16>
    %45 = vector.extract_strided_slice %40 {offsets = [0, 128], sizes = [8, 64], strides = [1, 1]} : vector<8x192xf32> to vector<8x64xf32>
    %46 = arith.truncf %45 : vector<8x64xf32> to vector<8x64xbf16>
    %47 = vector.extract_strided_slice %41 {offsets = [0, 0], sizes = [8, 16], strides = [1, 1]} : vector<8x64xf32> to vector<8x16xf32>
    %48 = arith.truncf %47 : vector<8x16xf32> to vector<8x16xbf16>
    %49 = vector.extract_strided_slice %44 {offsets = [0, 0], sizes = [16, 8], strides = [1, 1]} : vector<64x8xbf16> to vector<16x8xbf16>
    %cst_19 = arith.constant dense<0.000000e+00> : vector<8x8xf32>
    %50 = tpu.matmul %48, %49, %cst_19 {dimension_numbers = #tpu.dot_dimension_numbers<[1], [0], [0], [1], [0, 0, 1, 1], [], []>} : vector<8x16xbf16>, vector<16x8xbf16>, vector<8x8xf32> -> vector<8x8xf32>
    %cst_20 = arith.constant -1.000000e+30 : f32
    %51 = vector.broadcast %cst_20 : f32 to vector<8x8xf32>
    %52 = arith.select %2, %50, %51 : vector<8x8xi1>, vector<8x8xf32>
    %cst_21 = arith.constant dense<0xFF800000> : vector<8xf32>
    %53 = vector.multi_reduction <maximumf>, %52, %cst_21 [1] : vector<8x8xf32> to vector<8xf32>
    %54 = vector.shape_cast %53 : vector<8xf32> to vector<8x1xf32>
    %55 = vector.broadcast %54 : vector<8x1xf32> to vector<8x8xf32>
    %56 = arith.subf %52, %55 : vector<8x8xf32>
    %57 = math.exp %56 : vector<8x8xf32>
    %cst_22 = arith.constant dense<0.000000e+00> : vector<8xf32>
    %58 = vector.multi_reduction <add>, %57, %cst_22 [1] : vector<8x8xf32> to vector<8xf32>
    %59 = vector.shape_cast %58 : vector<8xf32> to vector<8x1xf32>
    %60 = tpu.reciprocal %59 {approx = true} : vector<8x1xf32> -> vector<8x1xf32>
    %61 = vector.broadcast %60 : vector<8x1xf32> to vector<8x8xf32>
    %62 = arith.mulf %57, %61 : vector<8x8xf32>
    %63 = arith.truncf %62 : vector<8x8xf32> to vector<8x8xbf16>
    %64 = vector.extract_strided_slice %46 {offsets = [0, 0], sizes = [8, 16], strides = [1, 1]} : vector<8x64xbf16> to vector<8x16xbf16>
    %cst_23 = arith.constant dense<0.000000e+00> : vector<8x16xf32>
    %65 = tpu.matmul %63, %64, %cst_23 {dimension_numbers = #tpu.dot_dimension_numbers<[1], [0], [0], [1], [0, 0, 1, 1], [], []>} : vector<8x8xbf16>, vector<8x16xbf16>, vector<8x16xf32> -> vector<8x16xf32>
    %66 = vector.extract_strided_slice %41 {offsets = [0, 16], sizes = [8, 16], strides = [1, 1]} : vector<8x64xf32> to vector<8x16xf32>
    %67 = arith.truncf %66 : vector<8x16xf32> to vector<8x16xbf16>
    %68 = vector.extract_strided_slice %44 {offsets = [16, 0], sizes = [16, 8], strides = [1, 1]} : vector<64x8xbf16> to vector<16x8xbf16>
    %cst_24 = arith.constant dense<0.000000e+00> : vector<8x8xf32>
    %69 = tpu.matmul %67, %68, %cst_24 {dimension_numbers = #tpu.dot_dimension_numbers<[1], [0], [0], [1], [0, 0, 1, 1], [], []>} : vector<8x16xbf16>, vector<16x8xbf16>, vector<8x8xf32> -> vector<8x8xf32>
    %cst_25 = arith.constant -1.000000e+30 : f32
    %70 = vector.broadcast %cst_25 : f32 to vector<8x8xf32>
    %71 = arith.select %2, %69, %70 : vector<8x8xi1>, vector<8x8xf32>
    %cst_26 = arith.constant dense<0xFF800000> : vector<8xf32>
    %72 = vector.multi_reduction <maximumf>, %71, %cst_26 [1] : vector<8x8xf32> to vector<8xf32>
    %73 = vector.shape_cast %72 : vector<8xf32> to vector<8x1xf32>
    %74 = vector.broadcast %73 : vector<8x1xf32> to vector<8x8xf32>
    %75 = arith.subf %71, %74 : vector<8x8xf32>
    %76 = math.exp %75 : vector<8x8xf32>
    %cst_27 = arith.constant dense<0.000000e+00> : vector<8xf32>
    %77 = vector.multi_reduction <add>, %76, %cst_27 [1] : vector<8x8xf32> to vector<8xf32>
    %78 = vector.shape_cast %77 : vector<8xf32> to vector<8x1xf32>
    %79 = tpu.reciprocal %78 {approx = true} : vector<8x1xf32> -> vector<8x1xf32>
    %80 = vector.broadcast %79 : vector<8x1xf32> to vector<8x8xf32>
    %81 = arith.mulf %76, %80 : vector<8x8xf32>
    %82 = arith.truncf %81 : vector<8x8xf32> to vector<8x8xbf16>
    %83 = vector.extract_strided_slice %46 {offsets = [0, 16], sizes = [8, 16], strides = [1, 1]} : vector<8x64xbf16> to vector<8x16xbf16>
    %cst_28 = arith.constant dense<0.000000e+00> : vector<8x16xf32>
    %84 = tpu.matmul %82, %83, %cst_28 {dimension_numbers = #tpu.dot_dimension_numbers<[1], [0], [0], [1], [0, 0, 1, 1], [], []>} : vector<8x8xbf16>, vector<8x16xbf16>, vector<8x16xf32> -> vector<8x16xf32>
    %85 = vector.extract_strided_slice %41 {offsets = [0, 32], sizes = [8, 16], strides = [1, 1]} : vector<8x64xf32> to vector<8x16xf32>
    %86 = arith.truncf %85 : vector<8x16xf32> to vector<8x16xbf16>
    %87 = vector.extract_strided_slice %44 {offsets = [32, 0], sizes = [16, 8], strides = [1, 1]} : vector<64x8xbf16> to vector<16x8xbf16>
    %cst_29 = arith.constant dense<0.000000e+00> : vector<8x8xf32>
    %88 = tpu.matmul %86, %87, %cst_29 {dimension_numbers = #tpu.dot_dimension_numbers<[1], [0], [0], [1], [0, 0, 1, 1], [], []>} : vector<8x16xbf16>, vector<16x8xbf16>, vector<8x8xf32> -> vector<8x8xf32>
    %cst_30 = arith.constant -1.000000e+30 : f32
    %89 = vector.broadcast %cst_30 : f32 to vector<8x8xf32>
    %90 = arith.select %2, %88, %89 : vector<8x8xi1>, vector<8x8xf32>
    %cst_31 = arith.constant dense<0xFF800000> : vector<8xf32>
    %91 = vector.multi_reduction <maximumf>, %90, %cst_31 [1] : vector<8x8xf32> to vector<8xf32>
    %92 = vector.shape_cast %91 : vector<8xf32> to vector<8x1xf32>
    %93 = vector.broadcast %92 : vector<8x1xf32> to vector<8x8xf32>
    %94 = arith.subf %90, %93 : vector<8x8xf32>
    %95 = math.exp %94 : vector<8x8xf32>
    %cst_32 = arith.constant dense<0.000000e+00> : vector<8xf32>
    %96 = vector.multi_reduction <add>, %95, %cst_32 [1] : vector<8x8xf32> to vector<8xf32>
    %97 = vector.shape_cast %96 : vector<8xf32> to vector<8x1xf32>
    %98 = tpu.reciprocal %97 {approx = true} : vector<8x1xf32> -> vector<8x1xf32>
    %99 = vector.broadcast %98 : vector<8x1xf32> to vector<8x8xf32>
    %100 = arith.mulf %95, %99 : vector<8x8xf32>
    %101 = arith.truncf %100 : vector<8x8xf32> to vector<8x8xbf16>
    %102 = vector.extract_strided_slice %46 {offsets = [0, 32], sizes = [8, 16], strides = [1, 1]} : vector<8x64xbf16> to vector<8x16xbf16>
    %cst_33 = arith.constant dense<0.000000e+00> : vector<8x16xf32>
    %103 = tpu.matmul %101, %102, %cst_33 {dimension_numbers = #tpu.dot_dimension_numbers<[1], [0], [0], [1], [0, 0, 1, 1], [], []>} : vector<8x8xbf16>, vector<8x16xbf16>, vector<8x16xf32> -> vector<8x16xf32>
    %104 = vector.extract_strided_slice %41 {offsets = [0, 48], sizes = [8, 16], strides = [1, 1]} : vector<8x64xf32> to vector<8x16xf32>
    %105 = arith.truncf %104 : vector<8x16xf32> to vector<8x16xbf16>
    %106 = vector.extract_strided_slice %44 {offsets = [48, 0], sizes = [16, 8], strides = [1, 1]} : vector<64x8xbf16> to vector<16x8xbf16>
    %cst_34 = arith.constant dense<0.000000e+00> : vector<8x8xf32>
    %107 = tpu.matmul %105, %106, %cst_34 {dimension_numbers = #tpu.dot_dimension_numbers<[1], [0], [0], [1], [0, 0, 1, 1], [], []>} : vector<8x16xbf16>, vector<16x8xbf16>, vector<8x8xf32> -> vector<8x8xf32>
    %cst_35 = arith.constant -1.000000e+30 : f32
    %108 = vector.broadcast %cst_35 : f32 to vector<8x8xf32>
    %109 = arith.select %2, %107, %108 : vector<8x8xi1>, vector<8x8xf32>
    %cst_36 = arith.constant dense<0xFF800000> : vector<8xf32>
    %110 = vector.multi_reduction <maximumf>, %109, %cst_36 [1] : vector<8x8xf32> to vector<8xf32>
    %111 = vector.shape_cast %110 : vector<8xf32> to vector<8x1xf32>
    %112 = vector.broadcast %111 : vector<8x1xf32> to vector<8x8xf32>
    %113 = arith.subf %109, %112 : vector<8x8xf32>
    %114 = math.exp %113 : vector<8x8xf32>
    %cst_37 = arith.constant dense<0.000000e+00> : vector<8xf32>
    %115 = vector.multi_reduction <add>, %114, %cst_37 [1] : vector<8x8xf32> to vector<8xf32>
    %116 = vector.shape_cast %115 : vector<8xf32> to vector<8x1xf32>
    %117 = tpu.reciprocal %116 {approx = true} : vector<8x1xf32> -> vector<8x1xf32>
    %118 = vector.broadcast %117 : vector<8x1xf32> to vector<8x8xf32>
    %119 = arith.mulf %114, %118 : vector<8x8xf32>
    %120 = arith.truncf %119 : vector<8x8xf32> to vector<8x8xbf16>
    %121 = vector.extract_strided_slice %46 {offsets = [0, 48], sizes = [8, 16], strides = [1, 1]} : vector<8x64xbf16> to vector<8x16xbf16>
    %cst_38 = arith.constant dense<0.000000e+00> : vector<8x16xf32>
    %122 = tpu.matmul %120, %121, %cst_38 {dimension_numbers = #tpu.dot_dimension_numbers<[1], [0], [0], [1], [0, 0, 1, 1], [], []>} : vector<8x8xbf16>, vector<8x16xbf16>, vector<8x16xf32> -> vector<8x16xf32>
    %123 = tpu.concatenate %65, %84, %103, %122 in 1 : vector<8x16xf32>, vector<8x16xf32>, vector<8x16xf32>, vector<8x16xf32> -> vector<8x64xf32>
    %c0_39 = arith.constant 0 : index
    %c0_40 = arith.constant 0 : index
    %c0_41 = arith.constant 0 : index
    %124 = vector.load %arg9[%c0_39, %c0_40, %c0_41] : memref<1x64x64xbf16, #tpu.memory_space<vmem>>, vector<1x64x64xbf16>
    %125 = vector.shape_cast %124 : vector<1x64x64xbf16> to vector<64x64xbf16>
    %126 = arith.truncf %123 : vector<8x64xf32> to vector<8x64xbf16>
    %cst_42 = arith.constant dense<0.000000e+00> : vector<8x64xf32>
    %127 = tpu.matmul %126, %125, %cst_42 {dimension_numbers = #tpu.dot_dimension_numbers<[1], [0], [0], [1], [0, 0, 1, 1], [], []>} : vector<8x64xbf16>, vector<64x64xbf16>, vector<8x64xf32> -> vector<8x64xf32>
    %128 = arith.addf %6, %127 : vector<8x64xf32>
    %c0_43 = arith.constant 0 : index
    %c0_44 = arith.constant 0 : index
    %c0_45 = arith.constant 0 : index
    %129 = vector.load %arg10[%c0_43, %c0_44, %c0_45] : memref<1x1x64xf32, #tpu.memory_space<vmem>>, vector<1x1x64xf32>
    %130 = vector.shape_cast %129 : vector<1x1x64xf32> to vector<1x64xf32>
    %131 = vector.broadcast %130 : vector<1x64xf32> to vector<8x64xf32>
    %132 = arith.addf %128, %131 : vector<8x64xf32>
    %c0_46 = arith.constant 0 : index
    %c0_47 = arith.constant 0 : index
    %c0_48 = arith.constant 0 : index
    %133 = vector.load %arg11[%c0_46, %c0_47, %c0_48] : memref<1x1x64xf32, #tpu.memory_space<vmem>>, vector<1x1x64xf32>
    %134 = vector.shape_cast %133 : vector<1x1x64xf32> to vector<1x64xf32>
    %c0_49 = arith.constant 0 : index
    %c0_50 = arith.constant 0 : index
    %c0_51 = arith.constant 0 : index
    %135 = vector.load %arg12[%c0_49, %c0_50, %c0_51] : memref<1x1x64xf32, #tpu.memory_space<vmem>>, vector<1x1x64xf32>
    %136 = vector.shape_cast %135 : vector<1x1x64xf32> to vector<1x64xf32>
    %cst_52 = arith.constant dense<0.000000e+00> : vector<8xf32>
    %137 = vector.multi_reduction <add>, %132, %cst_52 [1] : vector<8x64xf32> to vector<8xf32>
    %138 = vector.shape_cast %137 : vector<8xf32> to vector<8x1xf32>
    %cst_53 = arith.constant 6.400000e+01 : f32
    %139 = vector.broadcast %cst_53 : f32 to vector<8x1xf32>
    %140 = arith.divf %138, %139 : vector<8x1xf32>
    %141 = vector.broadcast %140 : vector<8x1xf32> to vector<8x64xf32>
    %142 = arith.subf %132, %141 : vector<8x64xf32>
    %143 = arith.mulf %142, %142 : vector<8x64xf32>
    %cst_54 = arith.constant dense<0.000000e+00> : vector<8xf32>
    %144 = vector.multi_reduction <add>, %143, %cst_54 [1] : vector<8x64xf32> to vector<8xf32>
    %145 = vector.shape_cast %144 : vector<8xf32> to vector<8x1xf32>
    %cst_55 = arith.constant 6.400000e+01 : f32
    %146 = vector.broadcast %cst_55 : f32 to vector<8x1xf32>
    %147 = arith.divf %145, %146 : vector<8x1xf32>
    %148 = vector.broadcast %140 : vector<8x1xf32> to vector<8x64xf32>
    %149 = arith.subf %132, %148 : vector<8x64xf32>
    %cst_56 = arith.constant 9.99999997E-7 : f32
    %150 = vector.broadcast %cst_56 : f32 to vector<8x1xf32>
    %151 = arith.addf %147, %150 : vector<8x1xf32>
    %152 = math.rsqrt %151 : vector<8x1xf32>
    %153 = vector.broadcast %152 : vector<8x1xf32> to vector<8x64xf32>
    %154 = arith.mulf %149, %153 : vector<8x64xf32>
    %155 = vector.broadcast %134 : vector<1x64xf32> to vector<8x64xf32>
    %156 = arith.mulf %154, %155 : vector<8x64xf32>
    %157 = vector.broadcast %136 : vector<1x64xf32> to vector<8x64xf32>
    %158 = arith.addf %156, %157 : vector<8x64xf32>
    %c0_57 = arith.constant 0 : index
    %c0_58 = arith.constant 0 : index
    %c0_59 = arith.constant 0 : index
    %159 = vector.load %arg13[%c0_57, %c0_58, %c0_59] : memref<1x64x256xbf16, #tpu.memory_space<vmem>>, vector<1x64x256xbf16>
    %160 = vector.shape_cast %159 : vector<1x64x256xbf16> to vector<64x256xbf16>
    %161 = arith.truncf %158 : vector<8x64xf32> to vector<8x64xbf16>
    %cst_60 = arith.constant dense<0.000000e+00> : vector<8x256xf32>
    %162 = tpu.matmul %161, %160, %cst_60 {dimension_numbers = #tpu.dot_dimension_numbers<[1], [0], [0], [1], [0, 0, 1, 1], [], []>} : vector<8x64xbf16>, vector<64x256xbf16>, vector<8x256xf32> -> vector<8x256xf32>
    %c0_61 = arith.constant 0 : index
    %c0_62 = arith.constant 0 : index
    %c0_63 = arith.constant 0 : index
    %163 = vector.load %arg14[%c0_61, %c0_62, %c0_63] : memref<1x1x256xf32, #tpu.memory_space<vmem>>, vector<1x1x256xf32>
    %164 = vector.shape_cast %163 : vector<1x1x256xf32> to vector<1x256xf32>
    %165 = vector.broadcast %164 : vector<1x256xf32> to vector<8x256xf32>
    %166 = arith.addf %162, %165 : vector<8x256xf32>
    %167 = arith.mulf %166, %166 : vector<8x256xf32>
    %168 = arith.mulf %166, %167 : vector<8x256xf32>
    %cst_64 = arith.constant 4.471500e-02 : f32
    %169 = vector.broadcast %cst_64 : f32 to vector<8x256xf32>
    %170 = arith.mulf %169, %168 : vector<8x256xf32>
    %171 = arith.addf %166, %170 : vector<8x256xf32>
    %cst_65 = arith.constant 0.797884583 : f32
    %172 = vector.broadcast %cst_65 : f32 to vector<8x256xf32>
    %173 = arith.mulf %172, %171 : vector<8x256xf32>
    %174 = math.tanh %173 : vector<8x256xf32>
    %cst_66 = arith.constant 1.000000e+00 : f32
    %175 = vector.broadcast %cst_66 : f32 to vector<8x256xf32>
    %176 = arith.addf %175, %174 : vector<8x256xf32>
    %cst_67 = arith.constant 5.000000e-01 : f32
    %177 = vector.broadcast %cst_67 : f32 to vector<8x256xf32>
    %178 = arith.mulf %177, %176 : vector<8x256xf32>
    %179 = arith.mulf %166, %178 : vector<8x256xf32>
    %c0_68 = arith.constant 0 : index
    %c0_69 = arith.constant 0 : index
    %c0_70 = arith.constant 0 : index
    %180 = vector.load %arg15[%c0_68, %c0_69, %c0_70] : memref<1x256x64xbf16, #tpu.memory_space<vmem>>, vector<1x256x64xbf16>
    %181 = vector.shape_cast %180 : vector<1x256x64xbf16> to vector<256x64xbf16>
    %182 = arith.truncf %179 : vector<8x256xf32> to vector<8x256xbf16>
    %cst_71 = arith.constant dense<0.000000e+00> : vector<8x64xf32>
    %183 = tpu.matmul %182, %181, %cst_71 {dimension_numbers = #tpu.dot_dimension_numbers<[1], [0], [0], [1], [0, 0, 1, 1], [], []>} : vector<8x256xbf16>, vector<256x64xbf16>, vector<8x64xf32> -> vector<8x64xf32>
    %184 = arith.addf %132, %183 : vector<8x64xf32>
    %c0_72 = arith.constant 0 : index
    %c0_73 = arith.constant 0 : index
    %c0_74 = arith.constant 0 : index
    %185 = vector.load %arg16[%c0_72, %c0_73, %c0_74] : memref<1x1x64xf32, #tpu.memory_space<vmem>>, vector<1x1x64xf32>
    %186 = vector.shape_cast %185 : vector<1x1x64xf32> to vector<1x64xf32>
    %187 = vector.broadcast %186 : vector<1x64xf32> to vector<8x64xf32>
    %188 = arith.addf %184, %187 : vector<8x64xf32>
    %c0_75 = arith.constant 0 : index
    %c0_76 = arith.constant 0 : index
    %189 = vector.load %arg22[%c0_75, %c0_76] : memref<8x64xf32, #tpu.memory_space<vmem>>, vector<8x64xf32>
    tpu.vector_store %arg22[%c0_75, %c0_76], %188 {strides = array<i32>} : memref<8x64xf32, #tpu.memory_space<vmem>>, vector<8x64xf32>,
    %c1_i32 = arith.constant 1 : i32
    %190 = arith.cmpi eq, %arg1, %c1_i32 : i32
    %191 = arith.extui %190 : i1 to i32
    %c0_i32_77 = arith.constant 0 : i32
    %192 = arith.cmpi ne, %191, %c0_i32_77 : i32
    scf.if %192 {
      %c0_78 = arith.constant 0 : index
      %c0_79 = arith.constant 0 : index
      %193 = vector.load %arg22[%c0_78, %c0_79] : memref<8x64xf32, #tpu.memory_space<vmem>>, vector<8x64xf32>
      %c0_80 = arith.constant 0 : index
      %c0_81 = arith.constant 0 : index
      %194 = vector.load %arg17[%c0_80, %c0_81] : memref<1x64xf32, #tpu.memory_space<vmem>>, vector<1x64xf32>
      %c0_82 = arith.constant 0 : index
      %c0_83 = arith.constant 0 : index
      %195 = vector.load %arg18[%c0_82, %c0_83] : memref<1x64xf32, #tpu.memory_space<vmem>>, vector<1x64xf32>
      %cst_84 = arith.constant dense<0.000000e+00> : vector<8xf32>
      %196 = vector.multi_reduction <add>, %193, %cst_84 [1] : vector<8x64xf32> to vector<8xf32>
      %197 = vector.shape_cast %196 : vector<8xf32> to vector<8x1xf32>
      %cst_85 = arith.constant 6.400000e+01 : f32
      %198 = vector.broadcast %cst_85 : f32 to vector<8x1xf32>
      %199 = arith.divf %197, %198 : vector<8x1xf32>
      %200 = vector.broadcast %199 : vector<8x1xf32> to vector<8x64xf32>
      %201 = arith.subf %193, %200 : vector<8x64xf32>
      %202 = arith.mulf %201, %201 : vector<8x64xf32>
      %cst_86 = arith.constant dense<0.000000e+00> : vector<8xf32>
      %203 = vector.multi_reduction <add>, %202, %cst_86 [1] : vector<8x64xf32> to vector<8xf32>
      %204 = vector.shape_cast %203 : vector<8xf32> to vector<8x1xf32>
      %cst_87 = arith.constant 6.400000e+01 : f32
      %205 = vector.broadcast %cst_87 : f32 to vector<8x1xf32>
      %206 = arith.divf %204, %205 : vector<8x1xf32>
      %207 = vector.broadcast %199 : vector<8x1xf32> to vector<8x64xf32>
      %208 = arith.subf %193, %207 : vector<8x64xf32>
      %cst_88 = arith.constant 9.99999997E-7 : f32
      %209 = vector.broadcast %cst_88 : f32 to vector<8x1xf32>
      %210 = arith.addf %206, %209 : vector<8x1xf32>
      %211 = math.rsqrt %210 : vector<8x1xf32>
      %212 = vector.broadcast %211 : vector<8x1xf32> to vector<8x64xf32>
      %213 = arith.mulf %208, %212 : vector<8x64xf32>
      %214 = vector.broadcast %194 : vector<1x64xf32> to vector<8x64xf32>
      %215 = arith.mulf %213, %214 : vector<8x64xf32>
      %216 = vector.broadcast %195 : vector<1x64xf32> to vector<8x64xf32>
      %217 = arith.addf %215, %216 : vector<8x64xf32>
      %c0_89 = arith.constant 0 : index
      %c0_90 = arith.constant 0 : index
      %218 = vector.load %arg19[%c0_89, %c0_90] : memref<64x128xbf16, #tpu.memory_space<vmem>>, vector<64x128xbf16>
      %219 = arith.truncf %217 : vector<8x64xf32> to vector<8x64xbf16>
      %cst_91 = arith.constant dense<0.000000e+00> : vector<8x128xf32>
      %220 = tpu.matmul %219, %218, %cst_91 {dimension_numbers = #tpu.dot_dimension_numbers<[1], [0], [0], [1], [0, 0, 1, 1], [], []>} : vector<8x64xbf16>, vector<64x128xbf16>, vector<8x128xf32> -> vector<8x128xf32>
      %c0_92 = arith.constant 0 : index
      %c0_93 = arith.constant 0 : index
      %221 = vector.load %arg20[%c0_92, %c0_93] : memref<1x128xf32, #tpu.memory_space<vmem>>, vector<1x128xf32>
      %222 = vector.broadcast %221 : vector<1x128xf32> to vector<8x128xf32>
      %223 = arith.addf %220, %222 : vector<8x128xf32>
      %c0_94 = arith.constant 0 : index
      %c0_95 = arith.constant 0 : index
      %224 = vector.load %arg21[%c0_94, %c0_95] : memref<8x128xf32, #tpu.memory_space<vmem>>, vector<8x128xf32>
      tpu.vector_store %arg21[%c0_94, %c0_95], %223 {strides = array<i32>} : memref<8x128xf32, #tpu.memory_space<vmem>>, vector<8x128xf32>,
    } else {
    }
    return
  }
  func.func @transform_0(%arg0: i32, %arg1: i32) -> (i32, i32) {
    %c0_i32 = arith.constant 0 : i32
    %c0_i32_0 = arith.constant 0 : i32
    return %arg0, %c0_i32 : i32, i32
  }
  func.func @transform_1(%arg0: i32, %arg1: i32) -> (i32, i32) {
    %c0_i32 = arith.constant 0 : i32
    %c0_i32_0 = arith.constant 0 : i32
    %c0_i32_1 = arith.constant 0 : i32
    return %c0_i32, %c0_i32_0 : i32, i32
  }
  func.func @transform_2(%arg0: i32, %arg1: i32) -> (i32, i32) {
    %c0_i32 = arith.constant 0 : i32
    %c0_i32_0 = arith.constant 0 : i32
    return %arg0, %c0_i32 : i32, i32
  }
  func.func @transform_3(%arg0: i32, %arg1: i32) -> (i32, i32, i32) {
    %c0_i32 = arith.constant 0 : i32
    %c0_i32_0 = arith.constant 0 : i32
    %c0_i32_1 = arith.constant 0 : i32
    return %arg1, %c0_i32, %c0_i32_0 : i32, i32, i32
  }
  func.func @transform_4(%arg0: i32, %arg1: i32) -> (i32, i32, i32) {
    %c0_i32 = arith.constant 0 : i32
    %c0_i32_0 = arith.constant 0 : i32
    %c0_i32_1 = arith.constant 0 : i32
    return %arg1, %c0_i32, %c0_i32_0 : i32, i32, i32
  }
  func.func @transform_5(%arg0: i32, %arg1: i32) -> (i32, i32, i32) {
    %c0_i32 = arith.constant 0 : i32
    %c0_i32_0 = arith.constant 0 : i32
    %c0_i32_1 = arith.constant 0 : i32
    return %arg1, %c0_i32, %c0_i32_0 : i32, i32, i32
  }
  func.func @transform_6(%arg0: i32, %arg1: i32) -> (i32, i32, i32) {
    %c0_i32 = arith.constant 0 : i32
    %c0_i32_0 = arith.constant 0 : i32
    %c0_i32_1 = arith.constant 0 : i32
    return %arg1, %c0_i32, %c0_i32_0 : i32, i32, i32
  }
  func.func @transform_7(%arg0: i32, %arg1: i32) -> (i32, i32, i32) {
    %c0_i32 = arith.constant 0 : i32
    %c0_i32_0 = arith.constant 0 : i32
    %c0_i32_1 = arith.constant 0 : i32
    return %arg1, %c0_i32, %c0_i32_0 : i32, i32, i32
  }
  func.func @transform_8(%arg0: i32, %arg1: i32) -> (i32, i32, i32) {
    %c0_i32 = arith.constant 0 : i32
    %c0_i32_0 = arith.constant 0 : i32
    %c0_i32_1 = arith.constant 0 : i32
    return %arg1, %c0_i32, %c0_i32_0 : i32, i32, i32
  }
  func.func @transform_9(%arg0: i32, %arg1: i32) -> (i32, i32, i32) {
    %c0_i32 = arith.constant 0 : i32
    %c0_i32_0 = arith.constant 0 : i32
    %c0_i32_1 = arith.constant 0 : i32
    return %arg1, %c0_i32, %c0_i32_0 : i32, i32, i32
  }
  func.func @transform_10(%arg0: i32, %arg1: i32) -> (i32, i32, i32) {
    %c0_i32 = arith.constant 0 : i32
    %c0_i32_0 = arith.constant 0 : i32
    %c0_i32_1 = arith.constant 0 : i32
    return %arg1, %c0_i32, %c0_i32_0 : i32, i32, i32
  }
  func.func @transform_11(%arg0: i32, %arg1: i32) -> (i32, i32, i32) {
    %c0_i32 = arith.constant 0 : i32
    %c0_i32_0 = arith.constant 0 : i32
    %c0_i32_1 = arith.constant 0 : i32
    return %arg1, %c0_i32, %c0_i32_0 : i32, i32, i32
  }
  func.func @transform_12(%arg0: i32, %arg1: i32) -> (i32, i32, i32) {
    %c0_i32 = arith.constant 0 : i32
    %c0_i32_0 = arith.constant 0 : i32
    %c0_i32_1 = arith.constant 0 : i32
    return %arg1, %c0_i32, %c0_i32_0 : i32, i32, i32
  }
  func.func @transform_13(%arg0: i32, %arg1: i32) -> (i32, i32, i32) {
    %c0_i32 = arith.constant 0 : i32
    %c0_i32_0 = arith.constant 0 : i32
    %c0_i32_1 = arith.constant 0 : i32
    return %arg1, %c0_i32, %c0_i32_0 : i32, i32, i32
  }
  func.func @transform_14(%arg0: i32, %arg1: i32) -> (i32, i32, i32) {
    %c0_i32 = arith.constant 0 : i32
    %c0_i32_0 = arith.constant 0 : i32
    %c0_i32_1 = arith.constant 0 : i32
    return %arg1, %c0_i32, %c0_i32_0 : i32, i32, i32
  }
  func.func @transform_15(%arg0: i32, %arg1: i32) -> (i32, i32) {
    %c0_i32 = arith.constant 0 : i32
    %c0_i32_0 = arith.constant 0 : i32
    %c0_i32_1 = arith.constant 0 : i32
    return %c0_i32, %c0_i32_0 : i32, i32
  }
  func.func @transform_16(%arg0: i32, %arg1: i32) -> (i32, i32) {
    %c0_i32 = arith.constant 0 : i32
    %c0_i32_0 = arith.constant 0 : i32
    %c0_i32_1 = arith.constant 0 : i32
    return %c0_i32, %c0_i32_0 : i32, i32
  }
  func.func @transform_17(%arg0: i32, %arg1: i32) -> (i32, i32) {
    %c0_i32 = arith.constant 0 : i32
    %c0_i32_0 = arith.constant 0 : i32
    %c0_i32_1 = arith.constant 0 : i32
    return %c0_i32, %c0_i32_0 : i32, i32
  }
  func.func @transform_18(%arg0: i32, %arg1: i32) -> (i32, i32) {
    %c0_i32 = arith.constant 0 : i32
    %c0_i32_0 = arith.constant 0 : i32
    %c0_i32_1 = arith.constant 0 : i32
    return %c0_i32, %c0_i32_0 : i32, i32
  }
  func.func @transform_19(%arg0: i32, %arg1: i32) -> (i32, i32) {
    %c0_i32 = arith.constant 0 : i32
    %c0_i32_0 = arith.constant 0 : i32
    return %arg0, %c0_i32 : i32, i32
  }
}

</mosaic_0001>

<bundles_post_ra>
// kernel: vit_forward.1
= control target key start
LH: loop header
LB: loop body
LE: loop exit
PB: predicated region body
PF: predicated region fallthrough
CT: control target
= control target key end

     0   :  { %s3098_s30 = smov 0   ;;  %s3100_s20 = smov 0   ;;  %s3552_s0 = inlined_call_operand.vmem [shape: f32[16,768], index: 0, kind: input, shape index: {}]   ;;  %s3553_s1 = inlined_call_operand.vmem [shape: bf16[768,64], index: 1, kind: input, shape index: {}]   ;;  %s3554_s2 = inlined_call_operand.vmem [shape: f32[16,64], index: 2, kind: input, shape index: {}]   ;;  %s3555_s3 = inlined_call_operand.vmem [shape: f32[2,1,64], index: 3, kind: input, shape index: {}]   ;;  %s3556_s4 = inlined_call_operand.vmem [shape: f32[2,1,64], index: 4, kind: input, shape index: {}]   ;;  %s3557_s5 = inlined_call_operand.vmem [shape: bf16[2,64,192], index: 5, kind: input, shape index: {}]   ;;  %s3558_s6 = inlined_call_operand.vmem [shape: f32[2,1,192], index: 6, kind: input, shape index: {}]   ;;  %s3559_s7 = inlined_call_operand.vmem [shape: bf16[2,64,64], index: 7, kind: input, shape index: {}]   ;;  %s3560_s8 = inlined_call_operand.vmem [shape: f32[2,1,64], index: 8, kind: input, shape index: {}]   ;;  %s3561_s9 = inlined_call_operand.vmem [shape: f32[2,1,64], index: 9, kind: input, shape index: {}]   ;;  %s3562_s10 = inlined_call_operand.vmem [shape: f32[2,1,64], index: 10, kind: input, shape index: {}]   ;;  %s3563_s11 = inlined_call_operand.vmem [shape: bf16[2,64,256], index: 11, kind: input, shape index: {}]   ;;  %s3564_s12 = inlined_call_operand.vmem [shape: f32[2,1,256], index: 12, kind: input, shape index: {}]   ;;  %s3565_s13 = inlined_call_operand.vmem [shape: bf16[2,256,64], index: 13, kind: input, shape index: {}]   ;;  %s3566_s14 = inlined_call_operand.vmem [shape: f32[2,1,64], index: 14, kind: input, shape index: {}]   ;;  %s3567_s15 = inlined_call_operand.vmem [shape: f32[1,64], index: 15, kind: input, shape index: {}]   ;;  %s3568_s16 = inlined_call_operand.vmem [shape: f32[1,64], index: 16, kind: input, shape index: {}]   ;;  %s3569_s17 = inlined_call_operand.vmem [shape: bf16[64,128], index: 17, kind: input, shape index: {}]   ;;  %s3570_s18 = inlined_call_operand.vmem [shape: f32[1,128], index: 18, kind: input, shape index: {}]   ;;  %s3571_s19 = inlined_call_operand.vmem [shape: f32[16,128], index: 19, kind: output, shape index: {}]  }
   0x1   :  { %3578 = sst [smem:[#allocation10_spill]] %s3552_s0  ;;  %s3096_s0 = smov 0  }
   0x2   :  { %3579 = sst [smem:[#allocation11_spill]] %s3553_s1  ;;  %s3102_s21 = smov 0  }
   0x3   :  { %3580 = sst [smem:[#allocation12_spill]] %s3554_s2  ;;  %s3104_s1 = smov 0  }
   0x4   :  { %3581 = sst [smem:[#allocation13_spill]] %s3555_s3 }
   0x5   :  { %3582 = sst [smem:[#allocation14_spill]] %s3556_s4 }
   0x6   :  { %3583 = sst [smem:[#allocation15_spill]] %s3557_s5 }
   0x7   :  { %3584 = sst [smem:[#allocation16_spill]] %s3558_s6 }
   0x8   :  { %3585 = sst [smem:[#allocation17_spill]] %s3559_s7 }
   0x9   :  { %3586 = sst [smem:[#allocation18_spill]] %s3567_s15 }
   0xa   :  { %3587 = sst [smem:[#allocation19_spill]] %s3568_s16 }
   0xb   :  { %3588 = sst [smem:[#allocation20_spill]] %s3569_s17 }
   0xc   :  { %3589 = sst [smem:[#allocation21_spill]] %s3570_s18 }
   0xd   :  { %3590 = sst [smem:[#allocation22_spill]] %s3571_s19 }
   0xe LB: > { %3591 = sst [smem:[#allocation3_spill]] %s2970_s0  ;;  %s38_s22 = sadd.s32 1, %s2978_s20  ;;  %s2986_s1 = sphi %s3104_s1, %s29_s1   ;;  %s2982_s21 = sphi %s3102_s21, %s3625_s21   ;;  %s2978_s20 = sphi %s3100_s20, %s3624_s20   ;;  %s2974_s30 = sphi %s3098_s30, %s3623_s30   ;;  %s2970_s0 = sphi %s3096_s0, %s3622_s0  }
   0xf   : > { %3592 = sst [smem:[#allocation4_spill]] %s2978_s20  ;;  %s41_s2 = sadd.s32 1, %s2982_s21 }
  0x10   : > { %3593 = sst [smem:[#allocation5_spill]] %s2982_s21  ;;  %p39_p0 = scmp.ge.s32.totalorder %s38_s22, 2 }
  0x11   : > { %3594 = sst [smem:[#allocation6_spill]] %s2986_s1  ;;  %p2385_p1 = scmp.ge.s32.totalorder %s2986_s1, 1 }
  0x12   : > { %p664_p2 = scmp.lt.s32.totalorder %s2986_s1, 5  ;;  %s3627_s22 = smov (%p39_p0, %s38_s22), 0 }
  0x13   : > { %3595 = sst [smem:[#allocation7_spill]] %s3627_s22  ;;  %s3629_s2 = smov (!%p39_p0, %s41_s2), %s2982_s21 }
  0x14   : > { %p665_p3 = pnand %p2385_p1, %p664_p2  ;;  %p43_p4 = scmp.ge.s32.totalorder %s3629_s2, 2 }
  0x16   : > { %s3631_s2 = smov (%p43_p4, %s3629_s2), 0  ;;  %668 = sbr.rel (%p665_p3) target bundleno = 2714 (0xa9a), region = 96 }
  0x17   : > { %3596 = sst [smem:[#allocation8_spill]] %s3631_s2 }
  0x1b   : > { %p769_p5 = scmp.lt.s32.totalorder %s2974_s30, 1  ;;  %p778_p6 = scmp.lt.s32.totalorder %s2970_s0, 1  ;;  %v829_v0 = vlaneseq }
  0x1c   : > { %s3597_s27 = sld [smem:[#allocation12_spill]] }
  0x1d   : > { %s3633_s30 = smov (!%p769_p5, %s2974_s30), 1  ;;  %v3129_v1 = vand.u32 127, %v829_v0  ;;  %s3600_s18 = sld [smem:[#allocation10_spill]] }
  0x1e   : > { %s3132_s23 = scalar_select %p778_p6, %s2970_s0, 1 }
  0x1f   : > { %s2861_s24 = smul.u32 48, %s3633_s30  ;;  %s2387_s25 = sshll.u32 %s3633_s30, 3  ;;  %vm831_vm0 = vcmp.lt.s32.totalorder %v3129_v1, 5 }
  0x20   : > { %s2769_s0 = sshll.u32 %s3132_s23, 6  ;;  %s2390_s19 = sshll.u32 %s3132_s23, 1 }
  0x21   : > { %s3602_s5 = sld [smem:[#allocation15_spill]]  ;;  %s2770_s20 = sshll.u32 %s3132_s23, 5 }
  0x22   : > { %s3138_s28 = scalar_lea.vmem %s3597_s27, %s2387_s25  ;;  %s3603_s6 = sld [smem:[#allocation16_spill]] }
  0x23   : > { %3598 = sst [smem:[#allocation9_spill]] %s3138_s28  ;;  %s3147_s16 = scalar_lea.vmem %s3600_s18, %s2861_s24 }
  0x24   : > { %s3604_s7 = sld [smem:[#allocation17_spill]]  ;;  %s3186_s4 = scalar_lea.vmem %s3563_s11, %s2769_s0 }
  0x25   : > { %s3191_s24 = scalar_lea.vmem %s3564_s12, %s2390_s19  ;;  %s3606_s2 = sld [smem:[#allocation3_spill]] }
  0x27   : > { %s3158_s27 = scalar_lea.vmem %s3602_s5, %s2769_s0  ;;  %s823_s5 = scalar_lea.vmem %s3566_s14, %s3132_s23 }
  0x28   : > { %s3163_s22 = scalar_lea.vmem %s3603_s6, %s2390_s19  ;;  %s3605_s6 = sld [smem:[#allocation22_spill]] }
  0x2a   : > { %s3173_s30 = scalar_lea.vmem %s3604_s7, %s2770_s20  ;;  %s2772_s20 = sshll.u32 %s3132_s23, 7 }
  0x2b   : > { %s3197_s17 = scalar_lea.vmem %s3565_s13, %s2772_s20  ;;  %p2399_p7 = scmp.ne.s32.totalorder %s3606_s2, 0 }
  0x2c   : > { %s3607_s18 = sld [smem:[#allocation11_spill]] (!%p2399_p7) }
  0x2d   : > { %835 = sbr.rel (%p2399_p7) target bundleno = 249 (0xf9), region = 100  ;;  %s3608_s15 = sld [smem:[#allocation9_spill]] (!%p2399_p7) }
  0x2e   : > { %s3206_s0 = scalar_lea.vmem %s3605_s6, %s2387_s25 }
  0x32   : > { %v2780_v2 = vld [vmem:[%s3607_s18 + $0x38] sm:$0xff]  ;;  %v2779_v4 = vld [vmem:[%s3607_s18 + $0x30] sm:$0xff]  ;;  %v2778_v10 = vld [vmem:[%s3607_s18 + $0x28] sm:$0xff]  ;;  %vm1311_vm1 = vcmask 523264  }
  0x33   : > { %v2788_v3 = vld [vmem:[%s3607_s18 + $0x78] sm:$0xff]  ;;  %1233 = vmatpush.bf16.msra.mxu0 %v2780_v2  ;;  %v2787_v5 = vld [vmem:[%s3607_s18 + $0x70] sm:$0xff]  ;;  %v2786_v11 = vld [vmem:[%s3607_s18 + $0x68] sm:$0xff] }
  0x34   : > { %1246 = vmatpush.bf16.msra.mxu1 %v2788_v3  ;;  %v2796_v6 = vld [vmem:[%s3607_s18 + $0xb8] sm:$0xff]  ;;  %v2795_v8 = vld [vmem:[%s3607_s18 + $0xb0] sm:$0xff]  ;;  %v2794_v12 = vld [vmem:[%s3607_s18 + $0xa8] sm:$0xff] }
  0x35   : > { %v2804_v7 = vld [vmem:[%s3607_s18 + $0xf8] sm:$0xff]  ;;  %1259 = vmatpush.bf16.msra.mxu2 %v2796_v6  ;;  %v2803_v9 = vld [vmem:[%s3607_s18 + $0xf0] sm:$0xff]  ;;  %v2802_v13 = vld [vmem:[%s3607_s18 + $0xe8] sm:$0xff] }
  0x36   : > { %1272 = vmatpush.bf16.msra.mxu3 %v2804_v7  ;;  %v2777_v14 = vld [vmem:[%s3607_s18 + $0x20] sm:$0xff]  ;;  %v2776_v18 = vld [vmem:[%s3607_s18 + $0x18] sm:$0xff]  ;;  %v2775_v22 = vld [vmem:[%s3607_s18 + $0x10] sm:$0xff] }
  0x37   : > { %1234 = vmatpush.bf16.msra.mxu0 %v2779_v4  ;;  %v2785_v15 = vld [vmem:[%s3607_s18 + $0x60] sm:$0xff]  ;;  %v2784_v19 = vld [vmem:[%s3607_s18 + $0x58] sm:$0xff]  ;;  %v2783_v23 = vld [vmem:[%s3607_s18 + $0x50] sm:$0xff] }
  0x38   : > { %1247 = vmatpush.bf16.msra.mxu1 %v2787_v5  ;;  %v2793_v16 = vld [vmem:[%s3607_s18 + $0xa0] sm:$0xff]  ;;  %v2792_v20 = vld [vmem:[%s3607_s18 + $0x98] sm:$0xff]  ;;  %v2791_v24 = vld [vmem:[%s3607_s18 + $0x90] sm:$0xff] }
  0x39   : > { %1260 = vmatpush.bf16.msra.mxu2 %v2795_v8  ;;  %v2801_v17 = vld [vmem:[%s3607_s18 + $0xe0] sm:$0xff]  ;;  %v2800_v21 = vld [vmem:[%s3607_s18 + $0xd8] sm:$0xff]  ;;  %v2799_v25 = vld [vmem:[%s3607_s18 + $0xd0] sm:$0xff] }
  0x3a   : > { %1273 = vmatpush.bf16.msra.mxu3 %v2803_v9  ;;  %v2774_v26 = vld [vmem:[%s3607_s18 + $0x8] sm:$0xff]  ;;  %v2773_v30 = vld [vmem:[%s3607_s18] sm:$0xff]  ;;  %v2812_v34 = vld [vmem:[%s3607_s18 + $0x138] sm:$0xff] }
  0x3b   : > { %1235 = vmatpush.bf16.msra.mxu0 %v2778_v10  ;;  %v2782_v27 = vld [vmem:[%s3607_s18 + $0x48] sm:$0xff]  ;;  %v2781_v31 = vld [vmem:[%s3607_s18 + $0x40] sm:$0xff]  ;;  %v2820_v35 = vld [vmem:[%s3607_s18 + $0x178] sm:$0xff] }
  0x3c   : > { %1248 = vmatpush.bf16.msra.mxu1 %v2786_v11  ;;  %v2790_v28 = vld [vmem:[%s3607_s18 + $0x88] sm:$0xff]  ;;  %v836_v32 = vld [vmem:[%s3147_s16] sm:$0xff]  ;;  %v838_v40 = vld [vmem:[%s3147_s16 + $0x10] sm:$0xff] }
  0x3d   : > { %1261 = vmatpush.bf16.msra.mxu2 %v2794_v12  ;;  %v2798_v29 = vld [vmem:[%s3607_s18 + $0xc8] sm:$0xff]  ;;  %v2789_v36 = vld [vmem:[%s3607_s18 + $0x80] sm:$0xff]  ;;  %v938_v38 = vpack.c.bf16 %v836_v32, %v836_v32  ;;  %v839_v41 = vld [vmem:[%s3147_s16 + $0x18] sm:$0xff]  ;;  %v940_v44 = vpack.c.bf16 %v838_v40, %v838_v40 }
  0x3e   : > { %1274 = vmatpush.bf16.msra.mxu3 %v2802_v13  ;;  %v837_v33 = vld [vmem:[%s3147_s16 + $0x8] sm:$0xff]  ;;  %v2797_v37 = vld [vmem:[%s3607_s18 + $0xc0] sm:$0xff]  ;;  %v2811_v42 = vld [vmem:[%s3607_s18 + $0x130] sm:$0xff]  ;;  %v941_v45 = vpack.c.bf16 %v839_v41, %v839_v41 }
  0x3f   : > { %1236 = vmatpush.bf16.msra.mxu0 %v2777_v14  ;;  %v939_v39 = vpack.c.bf16 %v837_v33, %v837_v33  ;;  %v2819_v43 = vld [vmem:[%s3607_s18 + $0x170] sm:$0xff]  ;;  %v2810_v46 = vld [vmem:[%s3607_s18 + $0x128] sm:$0xff]  ;;  %v2809_v48 = vld [vmem:[%s3607_s18 + $0x120] sm:$0xff] }
  0x40   : > { %1249 = vmatpush.bf16.msra.mxu1 %v2785_v15  ;;  %v2818_v47 = vld [vmem:[%s3607_s18 + $0x168] sm:$0xff]  ;;  %v2817_v49 = vld [vmem:[%s3607_s18 + $0x160] sm:$0xff]  ;;  %v2808_v50 = vld [vmem:[%s3607_s18 + $0x118] sm:$0xff] }
  0x41   : > { %1262 = vmatpush.bf16.msra.mxu2 %v2793_v16  ;;  %v2816_v51 = vld [vmem:[%s3607_s18 + $0x158] sm:$0xff]  ;;  %v2807_v52 = vld [vmem:[%s3607_s18 + $0x110] sm:$0xff]  ;;  %v2806_v54 = vld [vmem:[%s3607_s18 + $0x108] sm:$0xff] }
  0x42   : > { %1275 = vmatpush.bf16.msra.mxu3 %v2801_v17  ;;  %v2815_v53 = vld [vmem:[%s3607_s18 + $0x150] sm:$0xff]  ;;  %v2814_v55 = vld [vmem:[%s3607_s18 + $0x148] sm:$0xff]  ;;  %v2805_v56 = vld [vmem:[%s3607_s18 + $0x100] sm:$0xff] }
  0x43   : > { %1237 = vmatpush.bf16.msra.mxu0 %v2776_v18  ;;  %v2813_v57 = vld [vmem:[%s3607_s18 + $0x140] sm:$0xff]  ;;  %v841_v59 = vld [vmem:[%s3147_s16 + $0x28] sm:$0xff] }
  0x44   : > { %1250 = vmatpush.bf16.msra.mxu1 %v2784_v19  ;;  %v840_v58 = vld [vmem:[%s3147_s16 + $0x20] sm:$0xff]  ;;  %v943_v61 = vpack.c.bf16 %v841_v59, %v841_v59 }
  0x45   : > { %1263 = vmatpush.bf16.msra.mxu2 %v2792_v20  ;;  %v942_v60 = vpack.c.bf16 %v840_v58, %v840_v58  ;;  %v944_v5 = vld [vmem:[%s3608_s15] sm:$0xff] }
  0x46   : > { %1276 = vmatpush.bf16.msra.mxu3 %v2800_v21 }
  0x47   : > { %1238 = vmatpush.bf16.msra.mxu0 %v2775_v22 }
  0x48   : > { %1251 = vmatpush.bf16.msra.mxu1 %v2783_v23 }
  0x49   : > { %1264 = vmatpush.bf16.msra.mxu2 %v2791_v24 }
  0x4a   : > { %1277 = vmatpush.bf16.msra.mxu3 %v2799_v25 }
  0x4b   : > { %1239 = vmatpush.bf16.msra.mxu0 %v2774_v26 }
  0x4c   : > { %1252 = vmatpush.bf16.msra.mxu1 %v2782_v27 }
  0x4d   : > { %1265 = vmatpush.bf16.msra.mxu2 %v2790_v28 }
  0x4e   : > { %1278 = vmatpush.bf16.msra.mxu3 %v2798_v29 }
  0x4f   : > { %1240 = vmatpush.bf16.msra.mxu0 %v2773_v30 }
  0x50   : > { %1253 = vmatpush.bf16.msra.mxu1 %v2781_v31 }
  0x51   : > { %1266 = vmatpush.bf16.msra.mxu2 %v2789_v36 }
  0x52   : > { %1279 = vmatpush.bf16.msra.mxu3 %v2797_v37  ;;  %1241 = vmatmul.bf16.vlgmr.msra.gmra.mxu0 %v938_v38 }
  0x53   : > { %1285 = vmatpush.bf16.msrb.mxu0 %v2812_v34  ;;  %1254 = vmatmul.bf16.vlgmr.msra.gmra.mxu1 %v939_v39 }
  0x54   : > { %1298 = vmatpush.bf16.msrb.mxu1 %v2820_v35  ;;  %1267 = vmatmul.bf16.vlgmr.msra.gmra.mxu2 %v940_v44 }
  0x55   : > { %1280 = vmatmul.bf16.vlgmr.msra.gmra.mxu3 %v941_v45 }
  0x57   : > { %1286 = vmatpush.bf16.msrb.mxu0 %v2811_v42 }
  0x58   : > { %1299 = vmatpush.bf16.msrb.mxu1 %v2819_v43 }
  0x5b   : > { %1287 = vmatpush.bf16.msrb.mxu0 %v2810_v46 }
  0x5c   : > { %1300 = vmatpush.bf16.msrb.mxu1 %v2818_v47 }
  0x5f   : > { %1288 = vmatpush.bf16.msrb.mxu0 %v2809_v48 }
  0x60   : > { %1301 = vmatpush.bf16.msrb.mxu1 %v2817_v49 }
  0x63   : > { %1289 = vmatpush.bf16.msrb.mxu0 %v2808_v50 }
  0x64   : > { %1302 = vmatpush.bf16.msrb.mxu1 %v2816_v51 }
  0x67   : > { %1290 = vmatpush.bf16.msrb.mxu0 %v2807_v52 }
  0x68   : > { %1303 = vmatpush.bf16.msrb.mxu1 %v2815_v53 }
  0x6b   : > { %1291 = vmatpush.bf16.msrb.mxu0 %v2806_v54 }
  0x6c   : > { %1304 = vmatpush.bf16.msrb.mxu1 %v2814_v55 }
  0x6f   : > { %1292 = vmatpush.bf16.msrb.mxu0 %v2805_v56 }
  0x70   : > { %1305 = vmatpush.bf16.msrb.mxu1 %v2813_v57 }
  0x72   : > { %1293 = vmatmul.bf16.vlgmr.msrb.gmra.mxu0 %v942_v60 }
  0x73   : > { %1306 = vmatmul.bf16.vlgmr.msrb.gmra.mxu1 %v943_v61 }
  0xcf   : > { %v1242_v62 = vpop.f32.mrf.mxu0 }
  0xd0   : > { %v1255_v63 = vpop.f32.mrf.mxu1  ;;  %v1243_v6 = vadd.f32 %v1242_v62, %v944_v5 }
  0xd2   : > { %v1256_v9 = vadd.f32 %v1255_v63, %v1243_v6 }
  0xd7   : > { %v1244_v0 = vpop.f32.mrf.mxu0  ;;  %v1268_v3 = vpop.f32.mrf.mxu2 }
  0xd8   : > { %v1257_v2 = vpop.f32.mrf.mxu1  ;;  %v1281_v4 = vpop.f32.mrf.mxu3  ;;  %v1269_v10 = vadd.f32 %v1268_v3, %v1256_v9 }
  0xda   : > { %v1282_v11 = vadd.f32 %v1281_v4, %v1269_v10 }
  0xdf   : > { %v1270_v7 = vpop.f32.mrf.mxu2 }
  0xe0   : > { %v1283_v8 = vpop.f32.mrf.mxu3 }
  0xef   : > { %v1294_v12 = vpop.f32.mrf.mxu0 }
  0xf0   : > { %v1307_v13 = vpop.f32.mrf.mxu1  ;;  %v1295_v14 = vadd.f32 %v1294_v12, %v1282_v11 }
  0xf2   : > { %v1308_v15 = vadd.f32 %v1307_v13, %v1295_v14 }
  0xf4   : > { %1312 = vst.msk [vmem:[#allocation2] sm:$0xff] %vm1311_vm1, %v1308_v15 }
  0xf7   : > { %v1296_v16 = vpop.f32.mrf.mxu0 }
  0xf8   : > { %v1309_v17 = vpop.f32.mrf.mxu1 }
  0xf9 PF: > { %vm1316_vm2 = vcmask 523264   ;;  %v2988_v20 = vmov 64.0   ;;  %v2618_v32 = vld [vmem:[%s3158_s27 + $0x30] sm:$0xf]  ;;  %v2828_v33 = vld [vmem:[%s3158_s27 + $0x34] sm:$0xf0]  ;;  %s3613_s3 = scalar_lea.vmem %s3560_s8, %s3132_s23  ;;  %s3615_s21 = scalar_lea.vmem %s3562_s10, %s3132_s23 }
  0xfa   : > { %2917 = vrcp.f32 %v2988_v20  ;;  %v2619_v34 = vor.u32 %v2828_v33, %v2618_v32  ;;  %v2610_v35 = vld [vmem:[%s3158_s27 + $0x20] sm:$0xf]  ;;  %v2826_v36 = vld [vmem:[%s3158_s27 + $0x24] sm:$0xf0]  ;;  %v2602_v38 = vld [vmem:[%s3158_s27 + $0x10] sm:$0xf] }
  0xfb   : > { %v3360_v18 = vld [vmem:[#allocation2] sm:$0xff]  ;;  %v2611_v37 = vor.u32 %v2826_v36, %v2610_v35  ;;  %v2824_v39 = vld [vmem:[%s3158_s27 + $0x14] sm:$0xf0]  ;;  %v2822_v42 = vld [vmem:[%s3158_s27 + $0x4] sm:$0xf0]  ;;  %s3609_s25 = sld [smem:[#allocation13_spill]] }
  0xfc   : > { %v1317_v19 = vsel %vm1316_vm2, %v3360_v18, 0.0  ;;  %1416 = vmatpush.bf16.msra.mxu1 %v2619_v34  ;;  %v2603_v40 = vor.u32 %v2824_v39, %v2602_v38  ;;  %v2594_v41 = vld [vmem:[%s3158_s27] sm:$0xf]  ;;  %v2827_v44 = vld [vmem:[%s3158_s27 + $0x34] sm:$0xf]  ;;  %s3611_s26 = sld [smem:[#allocation14_spill]] }
  0xfd   : > { %1318 = vadd.xlane.f32.xlu0 %v1317_v19  ;;  %v2595_v43 = vor.u32 %v2822_v42, %v2594_v41  ;;  %v2620_v45 = vld [vmem:[%s3158_s27 + $0x38] sm:$0xf0]  ;;  %v2825_v47 = vld [vmem:[%s3158_s27 + $0x24] sm:$0xf]  ;;  %v2612_v48 = vld [vmem:[%s3158_s27 + $0x28] sm:$0xf0] }
  0xfe   : > { %v2623_v46 = vor.u32 %v2827_v44, %v2620_v45  ;;  %v2615_v50 = vor.u32 %v2825_v47, %v2612_v48  ;;  %v2823_v52 = vld [vmem:[%s3158_s27 + $0x14] sm:$0xf]  ;;  %v2604_v53 = vld [vmem:[%s3158_s27 + $0x18] sm:$0xf0]  ;;  %v2821_v56 = vld [vmem:[%s3158_s27 + $0x4] sm:$0xf] }
  0xff   : > { %v2607_v55 = vor.u32 %v2823_v52, %v2604_v53  ;;  %v2596_v57 = vld [vmem:[%s3158_s27 + $0x8] sm:$0xf0]  ;;  %v1363_v9 = vld [vmem:[%s3163_s22] sm:$0x3]  ;;  %s2989_s7 = smov 64   ;;  %s2990_s2 = smov 96  }
 0x100   : > { %v2918_v21 = vpop.eup %2917  ;;  %1417 = vmatpush.bf16.msra.mxu1 %v2611_v37  ;;  %v2599_v58 = vor.u32 %v2821_v56, %v2596_v57  ;;  %v1365_v10 = vperm.slane %v1363_v9, 0  ;;  %s2991_s19 = smov 112   ;;  %s2992_s1 = smov 80   ;;  %v1366_v15 = vperm.slane %v1363_v9, 1  ;;  %vm1524_vm7 = vcmask 1043456  }
 0x101   : > { %v1321_v22 = vmul.f32 64.0, %v2918_v21  ;;  %vm1325_vm3 = vweird.f32 %v2918_v21  ;;  %s3610_s28 = scalar_lea.vmem %s3609_s25, %s3132_s23  ;;  %vm1490_vm8 = vcmask 130048   ;;  %vm1508_vm9 = vcmask 64512   ;;  %s2993_s22 = smov 16  }
 0x102   : > { %v2911_v2 = vld [vmem:[%s3610_s28] ss:$0 sm:$0xff]  ;;  %s3612_s6 = scalar_lea.vmem %s3611_s26, %s3132_s23  ;;  %s2994_s29 = smov 32   ;;  %vm1732_vm10 = vcmask 261120   ;;  %vm1734_vm11 = vcmask 392192  }
 0x103   : > { %v1322_v23 = vsub.f32 1.0, %v1321_v22  ;;  %v2912_v5 = vld [vmem:[%s3612_s6] ss:$0 sm:$0xff]  ;;  %s2995_s20 = smov 48   ;;  %s3614_s25 = scalar_lea.vmem %s3561_s9, %s3132_s23 }
 0x104   : > { %1418 = vmatpush.bf16.msra.mxu1 %v2603_v40  ;;  %s3616_s26 = sld [smem:[#allocation3_spill]] }
 0x105   : > { %v1323_v24 = vmul.f32 %v2918_v21, %v1322_v23 }
 0x107   : > { %v1324_v25 = vadd.f32 %v2918_v21, %v1323_v24 }
 0x108   : > { %1419 = vmatpush.bf16.msra.mxu1 %v2595_v43 }
 0x109   : > { %v3364_v26 = vsel %vm1325_vm3, %v2918_v21, %v1324_v25 }
 0x10a   : > { %p2749_p8 = scmp.ne.s32.totalorder %s3616_s26, 1 }
 0x10b   : > { %s3617_s6 = sld [smem:[#allocation20_spill]] (!%p2749_p8) }
 0x10c   : > { %1429 = vmatpush.bf16.msrb.mxu1 %v2623_v46  ;;  %s3618_s16 = sld [smem:[#allocation18_spill]] (!%p2749_p8) }
 0x10d   : > { %s3620_s27 = sld [smem:[#allocation21_spill]] (!%p2749_p8) }
 0x110   : > { %1430 = vmatpush.bf16.msrb.mxu1 %v2615_v50 }
 0x114   : > { %1431 = vmatpush.bf16.msrb.mxu1 %v2607_v55 }
 0x118   : > { %1432 = vmatpush.bf16.msrb.mxu1 %v2599_v58 }
 0x170   : > { %v1319_v27 = vpop.xlane.xlu0 %1318 }
 0x171   : > { %v1327_v28 = vmul.f32 %v3364_v26, %v1319_v27 }
 0x173   : > { %v1328_v29 = vsub.f32 %v3360_v18, %v1327_v28 }
 0x175   : > { %v1329_v30 = vmul.f32 %v1328_v29, %v1328_v29 }
 0x177   : > { %v1330_v31 = vsel %vm1316_vm2, %v1329_v30, 0.0 }
 0x178   : > { %1331 = vadd.xlane.f32.xlu0 %v1330_v31 }
 0x1eb   : > { %v1332_v49 = vpop.xlane.xlu0 %1331 }
 0x1ec   : > { %v1333_v51 = vmul.f32 %v1332_v49, %v3364_v26 }
 0x1ee   : > { %v1334_v54 = vadd.f32 1e-06, %v1333_v51 }
 0x1f0   : > { %2919 = vrsqrt.f32 %v1334_v54  ;;  %vm1341_vm5 = vweird.f32 %v1334_v54 }
 0x1f6   : > { %v2920_v59 = vpop.eup %2919 }
 0x1f7   : > { %v1336_v60 = vmul.f32 %v2920_v59, %v1334_v54  ;;  %vm1342_vm4 = vweird.f32 %v2920_v59 }
 0x1f8   : > { %vm1343_vm6 = vmor %vm1341_vm5, %vm1342_vm4 }
 0x1f9   : > { %v1337_v61 = vmul.f32 %v2920_v59, %v1336_v60 }
 0x1fb   : > { %v1338_v62 = vmul.f32 0.5, %v1337_v61 }
 0x1fd   : > { %v1339_v63 = vsub.f32 1.5, %v1338_v62 }
 0x1ff   : > { %v1340_v0 = vmul.f32 %v2920_v59, %v1339_v63 }
 0x201   : > { %v1344_v3 = vsel %vm1343_vm6, %v2920_v59, %v1340_v0 }
 0x202   : > { %v1345_v4 = vmul.f32 %v1344_v3, %v1328_v29 }
 0x204   : > { %v1349_v6 = vmul.f32 %v2911_v2, %v1345_v4 }
 0x206   : > { %v1353_v7 = vadd.f32 %v2912_v5, %v1349_v6 }
 0x208   : > { %v1362_v8 = vpack.c.bf16 %v1353_v7, %v1353_v7 }
 0x20a   : > { %2624 = vmatmul.msk.bf16.vlgmr.msra.gmra.mxu1 %vm1316_vm2, %v1362_v8 }
 0x21a   : > { %2625 = vmatmul.msk.bf16.vlgmr.msrb.gmra.mxu1 %vm1316_vm2, %v1362_v8 }
 0x287   : > { %v1421_v11 = vpop.f32.mrf.mxu1 }
 0x288   : > { %v1422_v12 = vadd.f32 %v1421_v11, %v1365_v10 }
 0x28a   : > { %v1483_v13 = vpack.c.bf16 %v1422_v12, %v1422_v12  ;;  %1439 = vrot.lane.b32.xlu1 %v1422_v12, %s2989_s7 }
 0x28c   : > { %1603 = vrot.lane.b32.xlu0 %v1483_v13, %s2990_s2  ;;  %1542 = vrot.lane.b32.xlu2 %v1483_v13, %s2991_s19 }
 0x28f   : > { %v1423_v14 = vpop.f32.mrf.mxu1 }
 0x294   : > { %1661 = vrot.lane.b32.xlu2 %v1483_v13, %s2992_s1 }
 0x297   : > { %v1434_v16 = vpop.f32.mrf.mxu1 }
 0x298   : > { %v1435_v17 = vadd.f32 %v1434_v16, %v1366_v15 }
 0x29a   : > { %v3402_v19 = vpack.c.bf16 %v1435_v17, %v1435_v17 }
 0x29c   : > { %v1526_v20 = vsel %vm1524_vm7, %v3402_v19, 0  ;;  %v1580_v3 = vunpack.c.l.b16 %v3402_v19 }
 0x29d   : > { %1535 = vmatpush.bf16.msra.mxu3 %v1526_v20 }
 0x29e   : > { %v1581_v5 = vpack.c.b16 %v1580_v3, %v1580_v3 }
 0x29f   : > { %v1436_v21 = vpop.f32.mrf.mxu1 }
 0x2e6   : > { %v1543_v39 = vpop.permute.xlu2 %1542 }
 0x2ee   : > { %v1662_v54 = vpop.permute.xlu2 %1661 }
 0x2fc   : > { %v1440_v22 = vpop.permute.xlu1 %1439 }
 0x2fd   : > { %1442 = vxpose.xlu1.b32.start.end [1/1] (short) (narrow) %v1440_v22, 64 }
 0x2fe   : > { %v1604_v47 = vpop.permute.xlu0 %1603 }
 0x3a1   : > { %v1458_v23 = vpop.trf.xlu1 }
 0x3a2   : > { %v1474_v24 = vpack.c.bf16 %v1458_v23, %v1458_v23 }
 0x3a4   : > { %v1486_v28 = vunpack.c.l.b16 %v1474_v24 }
 0x3a9   : > { %v1459_v25 = vpop.trf.xlu1 }
 0x3aa   : > { %v1475_v27 = vpack.c.bf16 %v1459_v25, %v1459_v25 }
 0x3ac   : > { %v1487_v29 = vunpack.c.l.b16 %v1475_v27 }
 0x3ae   : > { %v1488_v30 = vpack.c.b16 %v1487_v29, %v1486_v28 }
 0x3b0   : > { %1501 = vmatpush.bf16.msra.mxu2 %v1488_v30 }
 0x3b1   : > { %v1460_v31 = vpop.trf.xlu1 }
 0x3b2   : > { %v1476_v32 = vpack.c.bf16 %v1460_v31, %v1460_v31 }
 0x3b3   : > { %2626 = vmatmul.msk.bf16.vlgmr.msra.gmra.mxu2 %vm1490_vm8, %v1483_v13 }
 0x3b4   : > { %v1546_v35 = vunpack.c.l.b16 %v1476_v32 }
 0x3b9   : > { %v1461_v33 = vpop.trf.xlu1 }
 0x3ba   : > { %v1477_v34 = vpack.c.bf16 %v1461_v33, %v1461_v33 }
 0x3bc   : > { %v1547_v36 = vunpack.c.l.b16 %v1477_v34 }
 0x3be   : > { %v1548_v37 = vpack.c.b16 %v1547_v36, %v1546_v35 }
 0x3c0   : > { %1560 = vmatpush.bf16.msrb.mxu2 %v1548_v37 }
 0x3c1   : > { %v1462_v38 = vpop.trf.xlu1 }
 0x3c2   : > { %v1478_v40 = vpack.c.bf16 %v1462_v38, %v1462_v38 }
 0x3c3   : > { %2628 = vmatmul.msk.bf16.vlgmr.msrb.gmra.mxu2 %vm1490_vm8, %v1543_v39 }
 0x3c4   : > { %v1607_v43 = vunpack.c.l.b16 %v1478_v40 }
 0x3c9   : > { %v1463_v41 = vpop.trf.xlu1 }
 0x3ca   : > { %v1479_v42 = vpack.c.bf16 %v1463_v41, %v1463_v41 }
 0x3cc   : > { %v1608_v44 = vunpack.c.l.b16 %v1479_v42 }
 0x3ce   : > { %v1609_v45 = vpack.c.b16 %v1608_v44, %v1607_v43 }
 0x3d0   : > { %1621 = vmatpush.bf16.msra.mxu0 %v1609_v45 }
 0x3d1   : > { %v1464_v46 = vpop.trf.xlu1 }
 0x3d2   : > { %v1480_v48 = vpack.c.bf16 %v1464_v46, %v1464_v46 }
 0x3d3   : > { %2630 = vmatmul.msk.bf16.vlgmr.msra.gmra.mxu0 %vm1490_vm8, %v1604_v47 }
 0x3d4   : > { %v1665_v51 = vunpack.c.l.b16 %v1480_v48 }
 0x3d9   : > { %v1465_v49 = vpop.trf.xlu1 }
 0x3da   : > { %v1481_v50 = vpack.c.bf16 %v1465_v49, %v1465_v49 }
 0x3dc   : > { %v1666_v52 = vunpack.c.l.b16 %v1481_v50 }
 0x3de   : > { %v1667_v53 = vpack.c.b16 %v1666_v52, %v1665_v51 }
 0x3e0   : > { %1679 = vmatpush.bf16.msra.mxu2 %v1667_v53 }
 0x3e3   : > { %2632 = vmatmul.msk.bf16.vlgmr.msra.gmra.mxu2 %vm1490_vm8, %v1662_v54 }
 0x436   : > { %v1503_v55 = vpop.f32.mrf.mxu2 }
 0x437   : > { %v1507_v56 = vsel %vm831_vm0, %v1503_v55, -1e+30 }
 0x438   : > { %v1509_v57 = vsel %vm1508_vm9, %v1507_v56, -inf }
 0x439   : > { %1510 = vmax.xlane.f32.xlu2 %v1509_v57 }
 0x43e   : > { %v1505_v58 = vpop.f32.mrf.mxu2 }
 0x43f   : > { %v2832_v58 = vld [vmem:[%s3173_s30 + $0x18] sm:$0xff] }
 0x440   : > { %1776 = vmatpush.bf16.msrb.mxu0 %v2832_v58 }
 0x446   : > { %v1562_v59 = vpop.f32.mrf.mxu2 }
 0x447   : > { %v1566_v60 = vsel %vm831_vm0, %v1562_v59, -1e+30 }
 0x448   : > { %v1567_v61 = vsel %vm1508_vm9, %v1566_v60, -inf }
 0x449   : > { %1568 = vmax.xlane.f32.xlu0 %v1567_v61 }
 0x44e   : > { %v1564_v62 = vpop.f32.mrf.mxu2 }
 0x44f   : > { %v2831_v62 = vld [vmem:[%s3173_s30 + $0x10] sm:$0xff] }
 0x450   : > { %v1623_v63 = vpop.f32.mrf.mxu0  ;;  %1777 = vmatpush.bf16.msrb.mxu0 %v2831_v62  ;;  %v2856_v62 = vld [vmem:[%s3197_s17 + $0x78] sm:$0xff] }
 0x451   : > { %v1627_v0 = vsel %vm831_vm0, %v1623_v63, -1e+30  ;;  %v2830_v63 = vld [vmem:[%s3173_s30 + $0x8] sm:$0xff] }
 0x452   : > { %v1628_v2 = vsel %vm1508_vm9, %v1627_v0, -inf }
 0x453   : > { %1629 = vmax.xlane.f32.xlu1 %v1628_v2 }
 0x454   : > { %1778 = vmatpush.bf16.msrb.mxu0 %v2830_v63  ;;  %v2846_v63 = vld [vmem:[%s3197_s17 + $0x28] sm:$0xff] }
 0x458   : > { %v1625_v4 = vpop.f32.mrf.mxu0 }
 0x45d   : > { %1582 = vrot.lane.b32.xlu0 %v1581_v5, %s2991_s19 }
 0x465   : > { %1640 = vrot.lane.b32.xlu0 %v1581_v5, %s2990_s2 }
 0x466   : > { %v1681_v6 = vpop.f32.mrf.mxu2 }
 0x467   : > { %v1685_v7 = vsel %vm831_vm0, %v1681_v6, -1e+30 }
 0x468   : > { %v1686_v8 = vsel %vm1508_vm9, %v1685_v7, -inf }
 0x469   : > { %1687 = vmax.xlane.f32.xlu2 %v1686_v8 }
 0x46e   : > { %v1683_v9 = vpop.f32.mrf.mxu2 }
 0x46f   : > { %v2913_v9 = vld [vmem:[%s3613_s3] ss:$0 sm:$0xff] }
 0x4ac   : > { %v1511_v10 = vpop.xlane.xlu2 %1510 }
 0x4ad   : > { %v1512_v11 = vsub.f32 %v1507_v56, %v1511_v10 }
 0x4af   : > { %v1513_v12 = vmul.f32 1.442695, %v1512_v11 }
 0x4b1   : > { %2921 = vpow2.f32 %v1513_v12 }
 0x4b7   : > { %v2922_v13 = vpop.eup %2921 }
 0x4b8   : > { %v1515_v14 = vsel %vm1508_vm9, %v2922_v13, 0.0 }
 0x4b9   : > { %1516 = vadd.xlane.f32.xlu2 %v1515_v14 }
 0x4bc   : > { %v1569_v15 = vpop.xlane.xlu0 %1568 }
 0x4bd   : > { %v1570_v16 = vsub.f32 %v1566_v60, %v1569_v15 }
 0x4bf   : > { %v1571_v17 = vmul.f32 1.442695, %v1570_v16 }
 0x4c1   : > { %2923 = vpow2.f32 %v1571_v17 }
 0x4c6   : > { %v1630_v19 = vpop.xlane.xlu1 %1629 }
 0x4c7   : > { %v2924_v20 = vpop.eup %2923  ;;  %v1631_v1 = vsub.f32 %v1627_v0, %v1630_v19  ;;  %v2829_v0 = vld [vmem:[%s3173_s30] sm:$0xff]  ;;  %s3619_s30 = sld [smem:[#allocation19_spill]] (!%p2749_p8) }
 0x4c8   : > { %v1573_v21 = vsel %vm1508_vm9, %v2924_v20, 0.0  ;;  %1779 = vmatpush.bf16.msrb.mxu0 %v2829_v0  ;;  %v2855_v0 = vld [vmem:[%s3197_s17 + $0x70] sm:$0xff] }
 0x4c9   : > { %v1632_v22 = vmul.f32 1.442695, %v1631_v1  ;;  %1574 = vadd.xlane.f32.xlu2 %v1573_v21  ;;  %v2840_v1 = vld [vmem:[%s3186_s4 + $0x34] sm:$0xf0]  ;;  %v2839_v21 = vld [vmem:[%s3186_s4 + $0x34] sm:$0xf] }
 0x4cb   : > { %2925 = vpow2.f32 %v1632_v22 }
 0x4cc   : > { %2068 = vmatpush.bf16.msra.mxu0 %v2856_v62 }
 0x4cf   : > { %v1583_v23 = vpop.permute.xlu0 %1582 }
 0x4d0   : > { %v1588_v24 = vsel %vm1524_vm7, %v1583_v23, 0  ;;  %v2679_v23 = vld [vmem:[%s3186_s4 + $0x38] sm:$0xf0]  ;;  %2069 = vmatpush.bf16.msra.mxu0 %v2855_v0 }
 0x4d1   : > { %v2926_v25 = vpop.eup %2925  ;;  %1597 = vmatpush.bf16.msrb.mxu3 %v1588_v24  ;;  %v2682_v24 = vor.u32 %v2839_v21, %v2679_v23 }
 0x4d2   : > { %v1634_v27 = vsel %vm1508_vm9, %v2926_v25, 0.0 }
 0x4d3   : > { %1635 = vadd.xlane.f32.xlu2 %v1634_v27  ;;  %1898 = vmatpush.bf16.msrb.mxu2 %v2682_v24  ;;  %v2838_v27 = vld [vmem:[%s3186_s4 + $0x24] sm:$0xf0] }
 0x4d7   : > { %v1641_v28 = vpop.permute.xlu0 %1640 }
 0x4d8   : > { %v1646_v29 = vsel %vm1524_vm7, %v1641_v28, 0  ;;  %v2837_v28 = vld [vmem:[%s3186_s4 + $0x24] sm:$0xf] }
 0x4d9   : > { %1655 = vmatpush.bf16.msra.mxu1 %v1646_v29 }
 0x4dc   : > { %v1688_v30 = vpop.xlane.xlu2 %1687 }
 0x4dd   : > { %v1689_v31 = vsub.f32 %v1685_v7, %v1688_v30  ;;  %v2671_v30 = vld [vmem:[%s3186_s4 + $0x28] sm:$0xf0] }
 0x4df   : > { %v1690_v32 = vmul.f32 1.442695, %v1689_v31  ;;  %v2674_v31 = vor.u32 %v2837_v28, %v2671_v30 }
 0x4e1   : > { %2927 = vpow2.f32 %v1690_v32  ;;  %1899 = vmatpush.bf16.msrb.mxu2 %v2674_v31  ;;  %v2661_v32 = vld [vmem:[%s3186_s4 + $0x10] sm:$0xf] }
 0x4e7   : > { %v2928_v33 = vpop.eup %2927 }
 0x4e8   : > { %v1692_v34 = vsel %vm1508_vm9, %v2928_v33, 0.0 }
 0x4e9   : > { %1693 = vadd.xlane.f32.xlu2 %v1692_v34  ;;  %v2835_v34 = vld [vmem:[%s3186_s4 + $0x14] sm:$0xf] }
 0x501   : > { %1698 = vrot.lane.b32.xlu2 %v1581_v5, %s2992_s1 }
 0x52c   : > { %v1517_v35 = vpop.xlane.xlu2 %1516 }
 0x52d   : > { %2929 = vrcp.f32 %v1517_v35 }
 0x533   : > { %v2930_v36 = vpop.eup %2929 }
 0x534   : > { %v1519_v37 = vmul.f32 %v2930_v36, %v2922_v13  ;;  %v2663_v36 = vld [vmem:[%s3186_s4 + $0x18] sm:$0xf0] }
 0x536   : > { %v1520_v38 = vpack.c.bf16 %v1519_v37, %v1519_v37  ;;  %v2666_v37 = vor.u32 %v2835_v34, %v2663_v36 }
 0x538   : > { %2627 = vmatmul.msk.bf16.vlgmr.msra.gmra.mxu3 %vm1508_vm9, %v1520_v38  ;;  %1900 = vmatpush.bf16.msrb.mxu2 %v2666_v37  ;;  %v2653_v38 = vld [vmem:[%s3186_s4] sm:$0xf] }
 0x53c   : > { %v1575_v39 = vpop.xlane.xlu2 %1574 }
 0x53d   : > { %2931 = vrcp.f32 %v1575_v39  ;;  %v2834_v39 = vld [vmem:[%s3186_s4 + $0x4] sm:$0xf0] }
 0x543   : > { %v2932_v40 = vpop.eup %2931 }
 0x544   : > { %v1577_v41 = vmul.f32 %v2932_v40, %v2924_v20  ;;  %v2833_v40 = vld [vmem:[%s3186_s4 + $0x4] sm:$0xf] }
 0x546   : > { %v1636_v42 = vpop.xlane.xlu2 %1635  ;;  %v1578_v43 = vpack.c.bf16 %v1577_v41, %v1577_v41  ;;  %v2654_v41 = vor.u32 %v2834_v39, %v2653_v38 }
 0x547   : > { %2933 = vrcp.f32 %v1636_v42  ;;  %v2655_v42 = vld [vmem:[%s3186_s4 + $0x8] sm:$0xf0] }
 0x548   : > { %2629 = vmatmul.msk.bf16.vlgmr.msrb.gmra.mxu3 %vm1508_vm9, %v1578_v43  ;;  %v2658_v43 = vor.u32 %v2833_v40, %v2655_v42 }
 0x54a   : > { %1901 = vmatpush.bf16.msrb.mxu2 %v2658_v43 }
 0x54d   : > { %v2934_v44 = vpop.eup %2933 }
 0x54e   : > { %v1638_v45 = vmul.f32 %v2934_v44, %v2926_v25  ;;  %v2669_v25 = vld [vmem:[%s3186_s4 + $0x20] sm:$0xf]  ;;  %v2848_v44 = vld [vmem:[%s3197_s17 + $0x38] sm:$0xff] }
 0x54f   : > { %v2670_v29 = vor.u32 %v2838_v27, %v2669_v25 }
 0x550   : > { %v1639_v46 = vpack.c.bf16 %v1638_v45, %v1638_v45 }
 0x552   : > { %2631 = vmatmul.msk.bf16.vlgmr.msra.gmra.mxu1 %vm1508_vm9, %v1639_v46 }
 0x55c   : > { %v1694_v47 = vpop.xlane.xlu2 %1693 }
 0x55d   : > { %2935 = vrcp.f32 %v1694_v47 }
 0x563   : > { %v2936_v48 = vpop.eup %2935 }
 0x564   : > { %v1696_v49 = vmul.f32 %v2936_v48, %v2928_v33  ;;  %v1699_v50 = vpop.permute.xlu2 %1698  ;;  %v2836_v33 = vld [vmem:[%s3186_s4 + $0x14] sm:$0xf0] }
 0x565   : > { %v1704_v51 = vsel %vm1524_vm7, %v1699_v50, 0  ;;  %v2662_v35 = vor.u32 %v2836_v33, %v2661_v32 }
 0x566   : > { %v1697_v52 = vpack.c.bf16 %v1696_v49, %v1696_v49  ;;  %1713 = vmatpush.bf16.msra.mxu3 %v1704_v51 }
 0x569   : > { %2633 = vmatmul.msk.bf16.vlgmr.msra.gmra.mxu3 %vm1508_vm9, %v1697_v52 }
 0x56a   : > { %2055 = vmatpush.bf16.msrb.mxu3 %v2848_v44 }
 0x5bb   : > { %v1537_v53 = vpop.f32.mrf.mxu3 }
 0x5c3   : > { %v1539_v54 = vpop.f32.mrf.mxu3 }
 0x5c4   : > { %v2914_v54 = vld [vmem:[%s3614_s25] ss:$0 sm:$0xff] }
 0x5cb   : > { %v1599_v55 = vpop.f32.mrf.mxu3 }
 0x5cc   : > { %1720 = vrot.lane.b32.xlu0 %v1599_v55, %s2993_s22 }
 0x5cf   : > { %v1657_v56 = vpop.f32.mrf.mxu1 }
 0x5d3   : > { %v1601_v57 = vpop.f32.mrf.mxu3 }
 0x5d4   : > { %1724 = vrot.lane.b32.xlu0 %v1657_v56, %s2994_s29  ;;  %v2915_v57 = vld [vmem:[%s3615_s21] ss:$0 sm:$0xff] }
 0x5d7   : > { %v1659_v59 = vpop.f32.mrf.mxu1 }
 0x5ec   : > { %v1715_v60 = vpop.f32.mrf.mxu3 }
 0x5ed   : > { %1728 = vrot.lane.b32.xlu2 %v1715_v60, %s2995_s20 }
 0x5f4   : > { %v1717_v61 = vpop.f32.mrf.mxu3 }
 0x5f5   : > { %v2847_v61 = vld [vmem:[%s3197_s17 + $0x30] sm:$0xff] }
 0x5f6   : > { %2056 = vmatpush.bf16.msrb.mxu3 %v2847_v61 }
 0x5fa   : > { %2057 = vmatpush.bf16.msrb.mxu3 %v2846_v63 }
 0x63e   : > { %v1721_v2 = vpop.permute.xlu0 %1720 }
 0x63f   : > { %v1731_v3 = vsel %vm1490_vm8, %v1537_v53, %v1721_v2  ;;  %v2845_v2 = vld [vmem:[%s3197_s17 + $0x20] sm:$0xff] }
 0x640   : > { %2058 = vmatpush.bf16.msrb.mxu3 %v2845_v2 }
 0x646   : > { %v1725_v4 = vpop.permute.xlu0 %1724 }
 0x647   : > { %v1733_v5 = vsel %vm1732_vm10, %v1731_v3, %v1725_v4  ;;  %v1729_v6 = vpop.permute.xlu2 %1728  ;;  %v2854_v3 = vld [vmem:[%s3197_s17 + $0x68] sm:$0xff]  ;;  %v2844_v4 = vld [vmem:[%s3197_s17 + $0x18] sm:$0xff] }
 0x648   : > { %v1735_v7 = vsel %vm1734_vm11, %v1733_v5, %v1729_v6  ;;  %2070 = vmatpush.bf16.msra.mxu0 %v2854_v3  ;;  %2059 = vmatpush.bf16.msrb.mxu3 %v2844_v4  ;;  %v2853_v5 = vld [vmem:[%s3197_s17 + $0x60] sm:$0xff]  ;;  %v2843_v6 = vld [vmem:[%s3197_s17 + $0x10] sm:$0xff] }
 0x649   : > { %v1744_v8 = vpack.c.bf16 %v1735_v7, %v1735_v7  ;;  %v2852_v7 = vld [vmem:[%s3197_s17 + $0x58] sm:$0xff] }
 0x64b   : > { %2650 = vmatmul.msk.bf16.vlgmr.msrb.gmra.mxu0 %vm1316_vm2, %v1744_v8  ;;  %v2842_v8 = vld [vmem:[%s3197_s17 + $0x8] sm:$0xff] }
 0x64c   : > { %2071 = vmatpush.bf16.msra.mxu0 %v2853_v5  ;;  %2060 = vmatpush.bf16.msrb.mxu3 %v2843_v6 }
 0x650   : > { %2072 = vmatpush.bf16.msra.mxu0 %v2852_v7  ;;  %2061 = vmatpush.bf16.msrb.mxu3 %v2842_v8 }
 0x6c8   : > { %v1781_v10 = vpop.f32.mrf.mxu0 }
 0x6c9   : > { %v1785_v11 = vadd.f32 %v1781_v10, %v3360_v18  ;;  %v2677_v18 = vld [vmem:[%s3186_s4 + $0x30] sm:$0xf]  ;;  %v2841_v10 = vld [vmem:[%s3197_s17] sm:$0xff] }
 0x6ca   : > { %v2678_v22 = vor.u32 %v2840_v1, %v2677_v18  ;;  %2062 = vmatpush.bf16.msrb.mxu3 %v2841_v10 }
 0x6cb   : > { %v3449_v12 = vadd.f32 %v2913_v9, %v1785_v11  ;;  %v2851_v9 = vld [vmem:[%s3197_s17 + $0x50] sm:$0xff]  ;;  %v2850_v11 = vld [vmem:[%s3197_s17 + $0x48] sm:$0xff] }
 0x6cc   : > { %1885 = vmatpush.bf16.msrb.mxu1 %v2678_v22  ;;  %2073 = vmatpush.bf16.msra.mxu0 %v2851_v9 }
 0x6cd   : > { %v1793_v13 = vsel %vm1316_vm2, %v3449_v12, 0.0 }
 0x6ce   : > { %1794 = vadd.xlane.f32.xlu0 %v1793_v13  ;;  %v1832_v13 = vld [vmem:[%s3191_s24] sm:$0x3] }
 0x6d0   : > { %v1783_v14 = vpop.f32.mrf.mxu0  ;;  %1886 = vmatpush.bf16.msrb.mxu1 %v2670_v29  ;;  %2074 = vmatpush.bf16.msra.mxu0 %v2850_v11 }
 0x6d1   : > { %v2849_v14 = vld [vmem:[%s3197_s17 + $0x40] sm:$0xff] }
 0x6d4   : > { %1887 = vmatpush.bf16.msrb.mxu1 %v2662_v35  ;;  %2075 = vmatpush.bf16.msra.mxu0 %v2849_v14 }
 0x6d8   : > { %1888 = vmatpush.bf16.msrb.mxu1 %v2654_v41 }
 0x741   : > { %v1795_v15 = vpop.xlane.xlu0 %1794 }
 0x742   : > { %v1796_v16 = vmul.f32 %v1795_v15, %v3364_v26  ;;  %v1834_v15 = vperm.slane %v1832_v13, 0 }
 0x744   : > { %v1797_v17 = vsub.f32 %v3449_v12, %v1796_v16 }
 0x746   : > { %v1798_v19 = vmul.f32 %v1797_v17, %v1797_v17 }
 0x748   : > { %v1799_v20 = vsel %vm1316_vm2, %v1798_v19, 0.0 }
 0x749   : > { %1800 = vadd.xlane.f32.xlu2 %v1799_v20  ;;  %v1835_v20 = vperm.slane %v1832_v13, 1 }
 0x7bc   : > { %v1801_v45 = vpop.xlane.xlu2 %1800 }
 0x7bd   : > { %v1802_v46 = vmul.f32 %v1801_v45, %v3364_v26 }
 0x7bf   : > { %v1803_v47 = vadd.f32 1e-06, %v1802_v46  ;;  %v2916_v46 = vld [vmem:[%s823_s5] ss:$0 sm:$0xff] }
 0x7c1   : > { %2937 = vrsqrt.f32 %v1803_v47  ;;  %vm1810_vm13 = vweird.f32 %v1803_v47 }
 0x7c7   : > { %v2938_v48 = vpop.eup %2937 }
 0x7c8   : > { %v1805_v49 = vmul.f32 %v2938_v48, %v1803_v47  ;;  %vm1811_vm12 = vweird.f32 %v2938_v48 }
 0x7c9   : > { %vm1812_vm14 = vmor %vm1810_vm13, %vm1811_vm12 }
 0x7ca   : > { %v1806_v50 = vmul.f32 %v2938_v48, %v1805_v49 }
 0x7cc   : > { %v1807_v51 = vmul.f32 0.5, %v1806_v50 }
 0x7ce   : > { %v1808_v52 = vsub.f32 1.5, %v1807_v51 }
 0x7d0   : > { %v1809_v53 = vmul.f32 %v2938_v48, %v1808_v52 }
 0x7d2   : > { %v1813_v55 = vsel %vm1812_vm14, %v2938_v48, %v1809_v53 }
 0x7d3   : > { %v1814_v56 = vmul.f32 %v1813_v55, %v1797_v17 }
 0x7d5   : > { %v1818_v58 = vmul.f32 %v2914_v54, %v1814_v56 }
 0x7d7   : > { %v1822_v59 = vadd.f32 %v2915_v57, %v1818_v58 }
 0x7d9   : > { %v1831_v60 = vpack.c.bf16 %v1822_v59, %v1822_v59 }
 0x7db   : > { %2683 = vmatmul.msk.bf16.vlgmr.msrb.gmra.mxu1 %vm1316_vm2, %v1831_v60  ;;  %2684 = vmatmul.msk.bf16.vlgmr.msrb.gmra.mxu2 %vm1316_vm2, %v1831_v60 }
 0x858   : > { %v1890_v16 = vpop.f32.mrf.mxu1 }
 0x859   : > { %v1891_v17 = vadd.f32 %v1890_v16, %v1834_v15 }
 0x85b   : > { %v1907_v19 = vmul.f32 %v1891_v17, %v1891_v17 }
 0x85d   : > { %v1909_v18 = vmul.f32 %v1907_v19, %v1891_v17 }
 0x85e   : > { %v1903_v1 = vpop.f32.mrf.mxu2 }
 0x85f   : > { %v1911_v21 = vmul.f32 0.044715, %v1909_v18  ;;  %v1904_v22 = vadd.f32 %v1903_v1, %v1835_v20 }
 0x860   : > { %v1892_v23 = vpop.f32.mrf.mxu1 }
 0x861   : > { %v1913_v24 = vadd.f32 %v1911_v21, %v1891_v17  ;;  %v1908_v25 = vmul.f32 %v1904_v22, %v1904_v22 }
 0x863   : > { %v1915_v27 = vmul.f32 0.7978846, %v1913_v24  ;;  %v1910_v28 = vmul.f32 %v1908_v25, %v1904_v22 }
 0x865   : > { %2939 = vtanh.f32 %v1915_v27  ;;  %v1912_v29 = vmul.f32 0.044715, %v1910_v28 }
 0x866   : > { %v1905_v30 = vpop.f32.mrf.mxu2 }
 0x867   : > { %v1914_v31 = vadd.f32 %v1912_v29, %v1904_v22 }
 0x869   : > { %v1916_v32 = vmul.f32 0.7978846, %v1914_v31 }
 0x86b   : > { %v2940_v33 = vpop.eup %2939  ;;  %2941 = vtanh.f32 %v1916_v32 }
 0x86c   : > { %v1919_v34 = vadd.f32 1.0, %v2940_v33 }
 0x86e   : > { %v1921_v35 = vmul.f32 0.5, %v1919_v34 }
 0x870   : > { %v1923_v36 = vmul.f32 %v1921_v35, %v1891_v17 }
 0x871   : > { %v2942_v37 = vpop.eup %2941 }
 0x872   : > { %v1957_v38 = vpack.c.bf16 %v1923_v36, %v1923_v36  ;;  %v1920_v39 = vadd.f32 1.0, %v2942_v37 }
 0x874   : > { %2063 = vmatmul.bf16.vlgmr.msrb.gmra.mxu3 %v1957_v38  ;;  %v1922_v40 = vmul.f32 0.5, %v1920_v39 }
 0x876   : > { %v1924_v41 = vmul.f32 %v1922_v40, %v1904_v22 }
 0x878   : > { %v1958_v42 = vpack.c.bf16 %v1924_v41, %v1924_v41 }
 0x87a   : > { %2076 = vmatmul.bf16.vlgmr.msra.gmra.mxu0 %v1958_v42 }
 0x8f7   : > { %v2064_v43 = vpop.f32.mrf.mxu3  ;;  %v2077_v44 = vpop.f32.mrf.mxu0 }
 0x8f8   : > { %v2078_v45 = vadd.f32 %v2077_v44, %v2064_v43 }
 0x8fa   : > { %v2081_v47 = vadd.f32 %v2078_v45, %v3449_v12 }
 0x8fb   : > { %2091 = sbr.rel (%p2749_p8) target bundleno = 2714 (0xa9a), region = 104 }
 0x8fc   : > { %v2086_v48 = vadd.f32 %v2916_v46, %v2081_v47 }
 0x8fe   : > { %2087 = vst.msk [vmem:[#allocation2] sm:$0xff] %vm1316_vm2, %v2086_v48 }
 0x8ff   : > { %v2066_v49 = vpop.f32.mrf.mxu3  ;;  %v2079_v50 = vpop.f32.mrf.mxu0 }
 0x900   : > { %v2860_v12 = vld [vmem:[%s3617_s6 + $0x18] sm:$0xff]  ;;  %v2859_v58 = vld [vmem:[%s3617_s6 + $0x10] sm:$0xff]  ;;  %v2858_v59 = vld [vmem:[%s3617_s6 + $0x8] sm:$0xff] }
 0x901   : > { %2169 = vmatpush.bf16.msra.mxu0 %v2860_v12  ;;  %v2857_v60 = vld [vmem:[%s3617_s6] sm:$0xff] }
 0x902   : > { %v2943_v7 = vld [vmem:[%s3618_s16] ss:$0 sm:$0xff] }
 0x903   : > { %v2945_v14 = vld [vmem:[%s3620_s27] ss:$0 sm:$0xff] }
 0x905   : > { %v2092_v51 = vld [vmem:[#allocation2] sm:$0xff]  ;;  %2170 = vmatpush.bf16.msra.mxu0 %v2859_v58 }
 0x906   : > { %v2095_v52 = vsel %vm1316_vm2, %v2092_v51, 0.0 }
 0x907   : > { %2096 = vadd.xlane.f32.xlu0 %v2095_v52 }
 0x909   : > { %2171 = vmatpush.bf16.msra.mxu0 %v2858_v59 }
 0x90d   : > { %2172 = vmatpush.bf16.msra.mxu0 %v2857_v60 }
 0x97a   : > { %v2097_v53 = vpop.xlane.xlu0 %2096 }
 0x97b   : > { %v2098_v54 = vmul.f32 %v2097_v53, %v3364_v26 }
 0x97d   : > { %v2099_v55 = vsub.f32 %v2092_v51, %v2098_v54 }
 0x97f   : > { %v2100_v56 = vmul.f32 %v2099_v55, %v2099_v55 }
 0x981   : > { %v2101_v57 = vsel %vm1316_vm2, %v2100_v56, 0.0 }
 0x982   : > { %2102 = vadd.xlane.f32.xlu0 %v2101_v57 }
 0x9f5   : > { %v2103_v61 = vpop.xlane.xlu0 %2102 }
 0x9f6   : > { %v2104_v62 = vmul.f32 %v2103_v61, %v3364_v26  ;;  %v2944_v26 = vld [vmem:[%s3619_s30] ss:$0 sm:$0xff] }
 0x9f8   : > { %v2105_v63 = vadd.f32 1e-06, %v2104_v62 }
 0x9fa   : > { %2946 = vrsqrt.f32 %v2105_v63  ;;  %vm2112_vm0 = vweird.f32 %v2105_v63 }
 0xa00   : > { %v2947_v0 = vpop.eup %2946 }
 0xa01   : > { %v2107_v2 = vmul.f32 %v2947_v0, %v2105_v63  ;;  %vm2113_vm15 = vweird.f32 %v2947_v0 }
 0xa02   : > { %vm2114_vm1 = vmor %vm2112_vm0, %vm2113_vm15 }
 0xa03   : > { %v2108_v3 = vmul.f32 %v2947_v0, %v2107_v2 }
 0xa05   : > { %v2109_v4 = vmul.f32 0.5, %v2108_v3 }
 0xa07   : > { %v2110_v5 = vsub.f32 1.5, %v2109_v4 }
 0xa09   : > { %v2111_v6 = vmul.f32 %v2947_v0, %v2110_v5 }
 0xa0b   : > { %v2115_v8 = vsel %vm2114_vm1, %v2947_v0, %v2111_v6 }
 0xa0c   : > { %v2116_v9 = vmul.f32 %v2115_v8, %v2099_v55 }
 0xa0e   : > { %v2120_v10 = vmul.f32 %v2943_v7, %v2116_v9 }
 0xa10   : > { %v2124_v11 = vadd.f32 %v2944_v26, %v2120_v10 }
 0xa12   : > { %v2133_v13 = vpack.c.bf16 %v2124_v11, %v2124_v11 }
 0xa14   : > { %2766 = vmatmul.msk.bf16.vlgmr.msra.gmra.mxu0 %vm1316_vm2, %v2133_v13 }
 0xa91   : > { %v2174_v15 = vpop.f32.mrf.mxu0 }
 0xa92   : > { %v2175_v16 = vadd.f32 %v2945_v14, %v2174_v15 }
 0xa94   : > { %2178 = vst [vmem:[%s3206_s0] sm:$0xff] %v2175_v16 }
 0xa99   : > { %v2176_v17 = vpop.f32.mrf.mxu0 }
 0xa9a PF: > { %s3621_s21 = sld [smem:[#allocation6_spill]] }
 0xa9b   : > { %s3622_s0 = sld [smem:[#allocation4_spill]] }
 0xa9c   : > { %s3623_s30 = sld [smem:[#allocation5_spill]] }
 0xa9d   : > { %s3624_s20 = sld [smem:[#allocation7_spill]] }
 0xaa0   : > { %s29_s1 = sadd.s32 1, %s3621_s21   ;;  %s3625_s21 = sld [smem:[#allocation8_spill]] }
 0xaa1   : > { %p26_p9 = scmp.ge.s32.totalorder %s29_s1, 6  }
 0xaa3   :  { %28 = sbr.rel (!%p26_p9) target bundleno = 14 (0xe), region = 173 }

</bundles_post_ra>
